<compile_context>
chip_gen: v5e
topology: v5e:2x2
jax: 0.10.0
libtpu: 0.0.40
codegen_flags: <defaults>
</compile_context>

<pallas_src>
import functools
import math

import jax
import jax.numpy as jnp
from jax.experimental import pallas as pl
from jax.experimental.pallas import tpu as pltpu


# ----------------------------- tiling helper --------------------------------

def _pick_tile(dim, target, quantum):
    """Largest tile <= target that divides dim, preferring multiples of quantum.

    If dim <= target the whole dim is one block (always legal on TPU since a
    block equal to the full array dim is exempt from the (8,128) rule)."""
    if dim <= target:
        return dim
    t = (target // quantum) * quantum
    while t >= quantum:
        if dim % t == 0:
            return t
        t -= quantum
    return dim


# ----------------------------- Pallas kernels -------------------------------

def _rms_matmul_kernel(x_ref, g_ref, w_ref, o_ref, *, eps):
    """o = rmsnorm(x) @ w  (norm fused into the matmul prologue; bf16 MXU)."""
    x = x_ref[...].astype(jnp.float32)
    inv = jax.lax.rsqrt(jnp.mean(x * x, axis=-1, keepdims=True) + eps)
    xn = (x * inv * g_ref[...]).astype(jnp.bfloat16)
    o_ref[...] = jnp.dot(xn, w_ref[...].astype(jnp.bfloat16),
                         preferred_element_type=jnp.float32).astype(o_ref.dtype)


def rmsnorm_matmul(x, gamma, w, *, eps=1e-5, tm=256, tn=512):
    M, E = x.shape
    E2, N = w.shape
    assert E == E2
    tm = _pick_tile(M, tm, 8)
    tn = _pick_tile(N, tn, 128)
    grid = (M // tm, N // tn)
    kern = functools.partial(_rms_matmul_kernel, eps=eps)
    return pl.pallas_call(
        kern,
        out_shape=jax.ShapeDtypeStruct((M, N), jnp.float32),
        grid=grid,
        in_specs=[pl.BlockSpec((tm, E), lambda i, j: (i, 0)),
                  pl.BlockSpec((1, E), lambda i, j: (0, 0)),
                  pl.BlockSpec((E, tn), lambda i, j: (0, j))],
        out_specs=pl.BlockSpec((tm, tn), lambda i, j: (i, j)),
        compiler_params=pltpu.CompilerParams(
            dimension_semantics=("parallel", "parallel")),
    )(x, gamma.reshape(1, E), w)


def _matmul_kernel(x_ref, w_ref, o_ref, acc_ref):
    """Tiled matmul with K-axis accumulation in a VMEM f32 scratch."""
    @pl.when(pl.program_id(2) == 0)
    def _():
        acc_ref[...] = jnp.zeros_like(acc_ref)

    acc_ref[...] += jnp.dot(x_ref[...].astype(jnp.bfloat16),
                            w_ref[...].astype(jnp.bfloat16),
                            preferred_element_type=jnp.float32)

    @pl.when(pl.program_id(2) == pl.num_programs(2) - 1)
    def _():
        o_ref[...] = acc_ref[...].astype(o_ref.dtype)


def matmul(x, w, *, tm=256, tn=512, tk=512):
    M, K = x.shape
    K2, N = w.shape
    assert K == K2
    tm = _pick_tile(M, tm, 8)
    tn = _pick_tile(N, tn, 128)
    tk = _pick_tile(K, tk, 128)
    grid = (M // tm, N // tn, K // tk)
    return pl.pallas_call(
        _matmul_kernel,
        out_shape=jax.ShapeDtypeStruct((M, N), jnp.float32),
        grid=grid,
        in_specs=[pl.BlockSpec((tm, tk), lambda i, j, k: (i, k)),
                  pl.BlockSpec((tk, tn), lambda i, j, k: (k, j))],
        out_specs=pl.BlockSpec((tm, tn), lambda i, j, k: (i, j)),
        scratch_shapes=[pltpu.VMEM((tm, tn), jnp.float32)],
        compiler_params=pltpu.CompilerParams(
            dimension_semantics=("parallel", "parallel", "arbitrary")),
    )(x, w)


def _ffn_kernel(x_ref, g_ref, w1_ref, w3_ref, w2_ref, o_ref, xn_ref, acc_ref, *, eps):
    """Fused RMSNorm + SwiGLU FFN, tiled over the hidden dim (accumulated)."""
    hi = pl.program_id(1)

    @pl.when(hi == 0)
    def _():
        x = x_ref[...].astype(jnp.float32)
        inv = jax.lax.rsqrt(jnp.mean(x * x, axis=-1, keepdims=True) + eps)
        xn_ref[...] = (x * inv * g_ref[...]).astype(xn_ref.dtype)
        acc_ref[...] = jnp.zeros_like(acc_ref)

    xn = xn_ref[...]
    h1 = jnp.dot(xn, w1_ref[...], preferred_element_type=jnp.float32)
    h3 = jnp.dot(xn, w3_ref[...], preferred_element_type=jnp.float32)
    g = (h1 * jax.nn.sigmoid(h1)) * h3              # SiLU(x@w1)*(x@w3), f32 on VPU/EUP
    acc_ref[...] += jnp.dot(g.astype(jnp.bfloat16), w2_ref[...],
                            preferred_element_type=jnp.float32)

    @pl.when(hi == pl.num_programs(1) - 1)
    def _():
        o_ref[...] = acc_ref[...].astype(o_ref.dtype)


def ffn(x, gamma, w1, w3, w2, *, eps=1e-5, tm=256, th=512):
    M, E = x.shape
    E2, H = w1.shape
    assert E == E2
    tm = _pick_tile(M, tm, 8)
    th = _pick_tile(H, th, 128)
    grid = (M // tm, H // th)
    kern = functools.partial(_ffn_kernel, eps=eps)
    return pl.pallas_call(
        kern,
        out_shape=jax.ShapeDtypeStruct((M, E), jnp.float32),
        grid=grid,
        in_specs=[pl.BlockSpec((tm, E), lambda i, h: (i, 0)),
                  pl.BlockSpec((1, E), lambda i, h: (0, 0)),
                  pl.BlockSpec((E, th), lambda i, h: (0, h)),
                  pl.BlockSpec((E, th), lambda i, h: (0, h)),
                  pl.BlockSpec((th, E), lambda i, h: (h, 0))],
        out_specs=pl.BlockSpec((tm, E), lambda i, h: (i, 0)),
        scratch_shapes=[pltpu.VMEM((tm, E), jnp.bfloat16),
                        pltpu.VMEM((tm, E), jnp.float32)],
        compiler_params=pltpu.CompilerParams(
            dimension_semantics=("parallel", "arbitrary")),
    )(x, gamma.reshape(1, E), w1, w3, w2)


def _flash_kernel(q_ref, k_ref, v_ref, o_ref, m_ref, l_ref, acc_ref,
                  *, scale, causal, tkv):
    """Flash-style causal attention: online softmax over KV tiles."""
    ki = pl.program_id(1)

    @pl.when(ki == 0)
    def _():
        m_ref[...] = jnp.full_like(m_ref, -1e30)
        l_ref[...] = jnp.zeros_like(l_ref)
        acc_ref[...] = jnp.zeros_like(acc_ref)

    q = q_ref[0].astype(jnp.bfloat16)               # (S, D)
    k = k_ref[0].astype(jnp.bfloat16)               # (tkv, D)
    v = v_ref[0].astype(jnp.bfloat16)               # (tkv, D)
    s = jax.lax.dot_general(q, k, (((1,), (1,)), ((), ())),
                            preferred_element_type=jnp.float32) * scale  # (S, tkv)
    if causal:
        S = q.shape[0]
        row = jax.lax.broadcasted_iota(jnp.int32, (S, tkv), 0)
        col = jax.lax.broadcasted_iota(jnp.int32, (S, tkv), 1) + ki * tkv
        s = jnp.where(col <= row, s, -1e30)          # finite mask (no -inf NaN risk)

    m_prev = m_ref[...]
    m_new = jnp.maximum(m_prev, jnp.max(s, axis=-1, keepdims=True))
    alpha = jnp.exp(m_prev - m_new)                  # f32 exp (v5e-friendly)
    p = jnp.exp(s - m_new)
    l_ref[...] = alpha * l_ref[...] + jnp.sum(p, axis=-1, keepdims=True)
    acc_ref[...] = alpha * acc_ref[...] + jnp.dot(
        p.astype(jnp.bfloat16), v, preferred_element_type=jnp.float32)
    m_ref[...] = m_new

    @pl.when(ki == pl.num_programs(1) - 1)
    def _():
        o_ref[0] = (acc_ref[...] * pl.reciprocal(l_ref[...], approx=True)
                    ).astype(o_ref.dtype)


def flash_attention(q, k, v, *, scale, causal=True, tkv=256):
    # q, k, v: (BH, S, D); one (batch, head) per outer grid step, KV tiled inside.
    BH, S, D = q.shape
    tkv = _pick_tile(S, tkv, 8)
    grid = (BH, S // tkv)
    kern = functools.partial(_flash_kernel, scale=scale, causal=causal, tkv=tkv)
    return pl.pallas_call(
        kern,
        out_shape=jax.ShapeDtypeStruct((BH, S, D), jnp.float32),
        grid=grid,
        in_specs=[pl.BlockSpec((1, S, D), lambda b, ki: (b, 0, 0)),
                  pl.BlockSpec((1, tkv, D), lambda b, ki: (b, ki, 0)),
                  pl.BlockSpec((1, tkv, D), lambda b, ki: (b, ki, 0))],
        out_specs=pl.BlockSpec((1, S, D), lambda b, ki: (b, 0, 0)),
        scratch_shapes=[pltpu.VMEM((S, 1), jnp.float32),
                        pltpu.VMEM((S, 1), jnp.float32),
                        pltpu.VMEM((S, D), jnp.float32)],
        compiler_params=pltpu.CompilerParams(
            dimension_semantics=("parallel", "arbitrary")),
    )(q, k, v)


def _lmhead_kernel(x_ref, g_ref, w_ref, o_ref, *, eps):
    """o = rmsnorm(x) @ w.T, contracting on w's last dim (no transposed copy)."""
    x = x_ref[...].astype(jnp.float32)
    inv = jax.lax.rsqrt(jnp.mean(x * x, axis=-1, keepdims=True) + eps)
    xn = (x * inv * g_ref[...]).astype(jnp.bfloat16)
    o_ref[...] = jax.lax.dot_general(
        xn, w_ref[...].astype(jnp.bfloat16),
        (((1,), (1,)), ((), ())),
        preferred_element_type=jnp.float32).astype(o_ref.dtype)


def lm_head(x, gamma, w, *, eps=1e-5, tn=512):
    # x: (B, E); w: (V, E) tied embedding streamed row-major, tiled over V.
    Bx, E = x.shape
    V, E2 = w.shape
    assert E == E2
    tn = _pick_tile(V, tn, 128)
    grid = (V // tn,)
    kern = functools.partial(_lmhead_kernel, eps=eps)
    return pl.pallas_call(
        kern,
        out_shape=jax.ShapeDtypeStruct((Bx, V), jnp.float32),
        grid=grid,
        in_specs=[pl.BlockSpec((Bx, E), lambda j: (0, 0)),
                  pl.BlockSpec((1, E), lambda j: (0, 0)),
                  pl.BlockSpec((tn, E), lambda j: (j, 0))],
        out_specs=pl.BlockSpec((Bx, tn), lambda j: (0, j)),
        compiler_params=pltpu.CompilerParams(
            dimension_semantics=("parallel",)),
    )(x, gamma.reshape(1, E), w)


# ------------------------------ JAX glue -------------------------------------

def precompute_freqs_cis(dim, end, theta=10000.0):
    freqs = 1.0 / theta ** (jnp.arange(0, dim, 2)[: dim // 2].astype(jnp.float32) / dim)
    t = jnp.arange(end, dtype=jnp.float32)
    freqs = jnp.outer(t, freqs)
    return jnp.cos(freqs), jnp.sin(freqs)


def apply_rope(x, cos, sin):
    # x: (B, S, H, D); cos/sin: (S, D/2). Interleaved (even, odd) pairs as in
    # the torch apply_rotary_emb.
    # TODO(synk): could move RoPE into the QKV/attention kernel via pltpu.roll
    # (with a de-interleaved head permutation); kept as tiny XLA glue here.
    B, S, H, D = x.shape
    xr = x.reshape(B, S, H, D // 2, 2)
    x_r, x_i = xr[..., 0], xr[..., 1]
    c = cos[None, :, None, :]
    s = sin[None, :, None, :]
    o_r = x_r * c - x_i * s
    o_i = x_r * s + x_i * c
    return jnp.stack([o_r, o_i], axis=-1).reshape(B, S, H, D)


def init_params(key, *, vocab_size, n_embd, n_head, n_hidden, n_layer,
                wdtype=jnp.bfloat16):
    std = 0.02
    std_small = 0.02 / math.sqrt(2 * n_layer)   # w3 / wo override
    keys = jax.random.split(key, 1 + n_layer * 7)
    params = {}
    params["tok_emb"] = (std * jax.random.normal(
        keys[0], (vocab_size, n_embd), jnp.float32)).astype(wdtype)   # tied LM head
    layers = []
    for l in range(n_layer):
        k = keys[1 + l * 7: 1 + (l + 1) * 7]
        wq = std * jax.random.normal(k[0], (n_embd, n_embd), jnp.float32)
        wk = std * jax.random.normal(k[1], (n_embd, n_embd), jnp.float32)
        wv = std * jax.random.normal(k[2], (n_embd, n_embd), jnp.float32)
        layers.append({
            "attn_norm": jnp.ones((n_embd,), jnp.float32),
            # fused QKV weight, stored (in, out) so y = x @ W
            "wqkv": jnp.concatenate([wq, wk, wv], axis=1).astype(wdtype),
            "wo": (std_small * jax.random.normal(
                k[3], (n_embd, n_embd), jnp.float32)).astype(wdtype),
            "ffn_norm": jnp.ones((n_embd,), jnp.float32),
            "w1": (std * jax.random.normal(
                k[4], (n_embd, n_hidden), jnp.float32)).astype(wdtype),
            "w3": (std_small * jax.random.normal(
                k[5], (n_embd, n_hidden), jnp.float32)).astype(wdtype),
            "w2": (std * jax.random.normal(
                k[6], (n_hidden, n_embd), jnp.float32)).astype(wdtype),
        })
    params["layers"] = layers
    params["final_norm"] = jnp.ones((n_embd,), jnp.float32)
    return params


def gpt_forward(idx, params, cos, sin, *, n_head, norm_eps=1e-5):
    # Inference path: targets=None, start_pos=0, use_kv_cache=False, is_causal.
    B, S = idx.shape
    V, E = params["tok_emb"].shape
    D = E // n_head
    scale = 1.0 / math.sqrt(D)

    h = params["tok_emb"][idx].astype(jnp.float32)       # (B, S, E) gather (XLA glue)
    cos_s, sin_s = cos[:S], sin[:S]

    for layer in params["layers"]:
        # ---- attention sub-block: fused rmsnorm + QKV, flash attention, out-proj
        x2d = h.reshape(B * S, E)
        qkv = rmsnorm_matmul(x2d, layer["attn_norm"], layer["wqkv"], eps=norm_eps)
        qkv = qkv.reshape(B, S, 3 * E)
        q = qkv[..., 0 * E:1 * E].reshape(B, S, n_head, D)
        k = qkv[..., 1 * E:2 * E].reshape(B, S, n_head, D)
        v = qkv[..., 2 * E:3 * E].reshape(B, S, n_head, D)
        q = apply_rope(q, cos_s, sin_s)
        k = apply_rope(k, cos_s, sin_s)
        # n_kv_head == n_head here, so repeat_kv is identity (n_rep == 1)
        qh = q.transpose(0, 2, 1, 3).reshape(B * n_head, S, D)
        kh = k.transpose(0, 2, 1, 3).reshape(B * n_head, S, D)
        vh = v.transpose(0, 2, 1, 3).reshape(B * n_head, S, D)
        o = flash_attention(qh, kh, vh, scale=scale, causal=True)
        o2d = o.reshape(B, n_head, S, D).transpose(0, 2, 1, 3).reshape(B * S, E)
        h = h + matmul(o2d, layer["wo"]).reshape(B, S, E)

        # ---- feed-forward sub-block: fused rmsnorm + SwiGLU, hidden stays in VMEM
        h = h + ffn(h.reshape(B * S, E), layer["ffn_norm"],
                    layer["w1"], layer["w3"], layer["w2"],
                    eps=norm_eps).reshape(B, S, E)

    # is_causal=True, targets=None -> only project the last position.
    # rmsnorm(h)[:, -1] == rmsnorm(h[:, -1]) (row-wise norm), fused into LM head.
    last = h[:, -1, :]                                    # (B, E)
    logits = lm_head(last, params["final_norm"], params["tok_emb"], eps=norm_eps)
    return logits.reshape(B, 1, V)


# ------------------------------ driver ---------------------------------------

if __name__ == "__main__":
    # Small config consistent with ModelConfig semantics.
    VOCAB = 256
    BLOCK = 16
    N_LAYER = 2
    N_EMBD = 64
    N_HEAD = 4
    N_HIDDEN = 128
    B, S = 2, 8

    key = jax.random.PRNGKey(0)
    kp, ki = jax.random.split(key)
    params = init_params(kp, vocab_size=VOCAB, n_embd=N_EMBD, n_head=N_HEAD,
                         n_hidden=N_HIDDEN, n_layer=N_LAYER)
    cos, sin = precompute_freqs_cis(N_EMBD // N_HEAD, BLOCK)

    idx = jax.random.randint(ki, (B, S), 0, VOCAB, dtype=jnp.int32)

    fwd = jax.jit(functools.partial(gpt_forward, n_head=N_HEAD))
    logits = fwd(idx, params, cos, sin)
    logits = jax.block_until_ready(logits)
    assert logits.shape == (B, 1, VOCAB), logits.shape
    assert bool(jnp.all(jnp.isfinite(logits)))
    print("KERNEL_OK")
</pallas_src>

<mosaic_0001>
module attributes {stable_mosaic.version = 11 : i64} {
  func.func @_rms_matmul_kernel(%arg0: i32, %arg1: i32, %arg2: memref<16x64xf32, #tpu.memory_space<vmem>>, %arg3: memref<1x64xf32, #tpu.memory_space<vmem>>, %arg4: memref<64x192xbf16, #tpu.memory_space<vmem>>, %arg5: memref<16x192xf32, #tpu.memory_space<vmem>>) attributes {dimension_semantics = [#tpu.dimension_semantics<parallel>, #tpu.dimension_semantics<parallel>], iteration_bounds = array<i64: 1, 1>, scalar_prefetch = 0 : i64, scratch_operands = 0 : i64, tpu.core_type = #tpu.core_type<tc>, window_params = [{transform_indices = @transform_0, window_bounds = array<i64: 16, 64>}, {pipeline_mode = #tpu.pipeline_mode<synchronous>, transform_indices = @transform_1, window_bounds = array<i64: 1, 64>}, {transform_indices = @transform_2, window_bounds = array<i64: 64, 192>}, {transform_indices = @transform_3, window_bounds = array<i64: 16, 192>}]} {
    %c0 = arith.constant 0 : index
    %c0_0 = arith.constant 0 : index
    %0 = vector.load %arg2[%c0, %c0_0] : memref<16x64xf32, #tpu.memory_space<vmem>>, vector<16x64xf32>
    %1 = arith.mulf %0, %0 : vector<16x64xf32>
    %cst = arith.constant dense<0.000000e+00> : vector<16xf32>
    %2 = vector.multi_reduction <add>, %1, %cst [1] : vector<16x64xf32> to vector<16xf32>
    %3 = vector.shape_cast %2 : vector<16xf32> to vector<16x1xf32>
    %cst_1 = arith.constant 6.400000e+01 : f32
    %4 = vector.broadcast %cst_1 : f32 to vector<16x1xf32>
    %5 = arith.divf %3, %4 : vector<16x1xf32>
    %cst_2 = arith.constant 9.99999974E-6 : f32
    %6 = vector.broadcast %cst_2 : f32 to vector<16x1xf32>
    %7 = arith.addf %5, %6 : vector<16x1xf32>
    %8 = math.rsqrt %7 : vector<16x1xf32>
    %9 = vector.broadcast %8 : vector<16x1xf32> to vector<16x64xf32>
    %10 = arith.mulf %0, %9 : vector<16x64xf32>
    %c0_3 = arith.constant 0 : index
    %c0_4 = arith.constant 0 : index
    %11 = vector.load %arg3[%c0_3, %c0_4] : memref<1x64xf32, #tpu.memory_space<vmem>>, vector<1x64xf32>
    %12 = vector.broadcast %11 : vector<1x64xf32> to vector<16x64xf32>
    %13 = arith.mulf %10, %12 : vector<16x64xf32>
    %14 = arith.truncf %13 : vector<16x64xf32> to vector<16x64xbf16>
    %c0_5 = arith.constant 0 : index
    %c0_6 = arith.constant 0 : index
    %15 = vector.load %arg4[%c0_5, %c0_6] : memref<64x192xbf16, #tpu.memory_space<vmem>>, vector<64x192xbf16>
    %cst_7 = arith.constant dense<0.000000e+00> : vector<16x192xf32>
    %16 = tpu.matmul %14, %15, %cst_7 {dimension_numbers = #tpu.dot_dimension_numbers<[1], [0], [0], [1], [0, 0, 1, 1], [], []>} : vector<16x64xbf16>, vector<64x192xbf16>, vector<16x192xf32> -> vector<16x192xf32>
    %c0_8 = arith.constant 0 : index
    %c0_9 = arith.constant 0 : index
    %17 = vector.load %arg5[%c0_8, %c0_9] : memref<16x192xf32, #tpu.memory_space<vmem>>, vector<16x192xf32>
    tpu.vector_store %arg5[%c0_8, %c0_9], %16 {strides = array<i32>} : memref<16x192xf32, #tpu.memory_space<vmem>>, vector<16x192xf32>,
    return
  }
  func.func @transform_0(%arg0: i32, %arg1: i32) -> (i32, i32) {
    %c0_i32 = arith.constant 0 : i32
    %c0_i32_0 = arith.constant 0 : i32
    return %arg0, %c0_i32 : i32, i32
  }
  func.func @transform_1(%arg0: i32, %arg1: i32) -> (i32, i32) {
    %c0_i32 = arith.constant 0 : i32
    %c0_i32_0 = arith.constant 0 : i32
    %c0_i32_1 = arith.constant 0 : i32
    return %c0_i32, %c0_i32_0 : i32, i32
  }
  func.func @transform_2(%arg0: i32, %arg1: i32) -> (i32, i32) {
    %c0_i32 = arith.constant 0 : i32
    %c0_i32_0 = arith.constant 0 : i32
    return %c0_i32, %arg1 : i32, i32
  }
  func.func @transform_3(%arg0: i32, %arg1: i32) -> (i32, i32) {
    %c0_i32 = arith.constant 0 : i32
    return %arg0, %arg1 : i32, i32
  }
}

module attributes {stable_mosaic.version = 11 : i64} {
  func.func @_flash_kernel(%arg0: i32, %arg1: i32, %arg2: memref<1x8x16xf32, #tpu.memory_space<vmem>>, %arg3: memref<1x8x16xf32, #tpu.memory_space<vmem>>, %arg4: memref<1x8x16xf32, #tpu.memory_space<vmem>>, %arg5: memref<1x8x16xf32, #tpu.memory_space<vmem>>, %arg6: memref<8x1xf32, #tpu.memory_space<vmem>>, %arg7: memref<8x1xf32, #tpu.memory_space<vmem>>, %arg8: memref<8x16xf32, #tpu.memory_space<vmem>>) attributes {dimension_semantics = [#tpu.dimension_semantics<parallel>, #tpu.dimension_semantics<arbitrary>], iteration_bounds = array<i64: 8, 1>, scalar_prefetch = 0 : i64, scratch_operands = 3 : i64, tpu.core_type = #tpu.core_type<tc>, window_params = [{transform_indices = @transform_0, window_bounds = array<i64: 1, 8, 16>}, {transform_indices = @transform_1, window_bounds = array<i64: 1, 8, 16>}, {transform_indices = @transform_2, window_bounds = array<i64: 1, 8, 16>}, {transform_indices = @transform_3, window_bounds = array<i64: 1, 8, 16>}]} {
    %c0_i32 = arith.constant 0 : i32
    %0 = arith.cmpi eq, %arg1, %c0_i32 : i32
    %1 = arith.extui %0 : i1 to i32
    %c0_i32_0 = arith.constant 0 : i32
    %2 = arith.cmpi ne, %1, %c0_i32_0 : i32
    scf.if %2 {
      %cst_28 = arith.constant -1.000000e+30 : f32
      %49 = vector.broadcast %cst_28 : f32 to vector<8x1xf32>
      %c0_29 = arith.constant 0 : index
      %c0_30 = arith.constant 0 : index
      %50 = vector.load %arg6[%c0_29, %c0_30] : memref<8x1xf32, #tpu.memory_space<vmem>>, vector<8x1xf32>
      tpu.vector_store %arg6[%c0_29, %c0_30], %49 {strides = array<i32>} : memref<8x1xf32, #tpu.memory_space<vmem>>, vector<8x1xf32>,
      %cst_31 = arith.constant 0.000000e+00 : f32
      %51 = vector.broadcast %cst_31 : f32 to vector<8x1xf32>
      %c0_32 = arith.constant 0 : index
      %c0_33 = arith.constant 0 : index
      %52 = vector.load %arg7[%c0_32, %c0_33] : memref<8x1xf32, #tpu.memory_space<vmem>>, vector<8x1xf32>
      tpu.vector_store %arg7[%c0_32, %c0_33], %51 {strides = array<i32>} : memref<8x1xf32, #tpu.memory_space<vmem>>, vector<8x1xf32>,
      %cst_34 = arith.constant 0.000000e+00 : f32
      %53 = vector.broadcast %cst_34 : f32 to vector<8x16xf32>
      %c0_35 = arith.constant 0 : index
      %c0_36 = arith.constant 0 : index
      %54 = vector.load %arg8[%c0_35, %c0_36] : memref<8x16xf32, #tpu.memory_space<vmem>>, vector<8x16xf32>
      tpu.vector_store %arg8[%c0_35, %c0_36], %53 {strides = array<i32>} : memref<8x16xf32, #tpu.memory_space<vmem>>, vector<8x16xf32>,
    } else {
    }
    %c0 = arith.constant 0 : index
    %c0_1 = arith.constant 0 : index
    %c0_2 = arith.constant 0 : index
    %3 = vector.load %arg2[%c0, %c0_1, %c0_2] : memref<1x8x16xf32, #tpu.memory_space<vmem>>, vector<1x8x16xf32>
    %4 = vector.shape_cast %3 : vector<1x8x16xf32> to vector<8x16xf32>
    %5 = arith.truncf %4 : vector<8x16xf32> to vector<8x16xbf16>
    %c0_3 = arith.constant 0 : index
    %c0_4 = arith.constant 0 : index
    %c0_5 = arith.constant 0 : index
    %6 = vector.load %arg3[%c0_3, %c0_4, %c0_5] : memref<1x8x16xf32, #tpu.memory_space<vmem>>, vector<1x8x16xf32>
    %7 = vector.shape_cast %6 : vector<1x8x16xf32> to vector<8x16xf32>
    %8 = arith.truncf %7 : vector<8x16xf32> to vector<8x16xbf16>
    %c0_6 = arith.constant 0 : index
    %c0_7 = arith.constant 0 : index
    %c0_8 = arith.constant 0 : index
    %9 = vector.load %arg4[%c0_6, %c0_7, %c0_8] : memref<1x8x16xf32, #tpu.memory_space<vmem>>, vector<1x8x16xf32>
    %10 = vector.shape_cast %9 : vector<1x8x16xf32> to vector<8x16xf32>
    %11 = arith.truncf %10 : vector<8x16xf32> to vector<8x16xbf16>
    %cst = arith.constant dense<0.000000e+00> : vector<8x8xf32>
    %12 = tpu.matmul %5, %8, %cst {dimension_numbers = #tpu.dot_dimension_numbers<[1], [1], [0], [0], [0, 0, 1, 0], [], []>} : vector<8x16xbf16>, vector<8x16xbf16>, vector<8x8xf32> -> vector<8x8xf32>
    %cst_9 = arith.constant 2.500000e-01 : f32
    %13 = vector.broadcast %cst_9 : f32 to vector<8x8xf32>
    %14 = arith.mulf %12, %13 : vector<8x8xf32>
    %15 = tpu.iota {dimensions = array<i32: 0>} : vector<8x8xi32>
    %16 = tpu.iota {dimensions = array<i32: 1>} : vector<8x8xi32>
    %c8_i32 = arith.constant 8 : i32
    %17 = arith.muli %arg1, %c8_i32 : i32
    %18 = vector.broadcast %17 : i32 to vector<8x8xi32>
    %19 = arith.addi %16, %18 : vector<8x8xi32>
    %20 = arith.cmpi sle, %19, %15 : vector<8x8xi32>
    %cst_10 = arith.constant -1.000000e+30 : f32
    %21 = vector.broadcast %cst_10 : f32 to vector<8x8xf32>
    %22 = arith.select %20, %14, %21 : vector<8x8xi1>, vector<8x8xf32>
    %c0_11 = arith.constant 0 : index
    %c0_12 = arith.constant 0 : index
    %23 = vector.load %arg6[%c0_11, %c0_12] : memref<8x1xf32, #tpu.memory_space<vmem>>, vector<8x1xf32>
    %cst_13 = arith.constant dense<0xFF800000> : vector<8xf32>
    %24 = vector.multi_reduction <maximumf>, %22, %cst_13 [1] : vector<8x8xf32> to vector<8xf32>
    %25 = vector.shape_cast %24 : vector<8xf32> to vector<8x1xf32>
    %26 = arith.maximumf %23, %25 : vector<8x1xf32>
    %27 = arith.subf %23, %26 : vector<8x1xf32>
    %28 = math.exp %27 : vector<8x1xf32>
    %29 = vector.broadcast %26 : vector<8x1xf32> to vector<8x8xf32>
    %30 = arith.subf %22, %29 : vector<8x8xf32>
    %31 = math.exp %30 : vector<8x8xf32>
    %c0_14 = arith.constant 0 : index
    %c0_15 = arith.constant 0 : index
    %32 = vector.load %arg7[%c0_14, %c0_15] : memref<8x1xf32, #tpu.memory_space<vmem>>, vector<8x1xf32>
    %33 = arith.mulf %28, %32 : vector<8x1xf32>
    %cst_16 = arith.constant dense<0.000000e+00> : vector<8xf32>
    %34 = vector.multi_reduction <add>, %31, %cst_16 [1] : vector<8x8xf32> to vector<8xf32>
    %35 = vector.shape_cast %34 : vector<8xf32> to vector<8x1xf32>
    %36 = arith.addf %33, %35 : vector<8x1xf32>
    %c0_17 = arith.constant 0 : index
    %c0_18 = arith.constant 0 : index
    %37 = vector.load %arg7[%c0_17, %c0_18] : memref<8x1xf32, #tpu.memory_space<vmem>>, vector<8x1xf32>
    tpu.vector_store %arg7[%c0_17, %c0_18], %36 {strides = array<i32>} : memref<8x1xf32, #tpu.memory_space<vmem>>, vector<8x1xf32>,
    %c0_19 = arith.constant 0 : index
    %c0_20 = arith.constant 0 : index
    %38 = vector.load %arg8[%c0_19, %c0_20] : memref<8x16xf32, #tpu.memory_space<vmem>>, vector<8x16xf32>
    %39 = vector.broadcast %28 : vector<8x1xf32> to vector<8x16xf32>
    %40 = arith.mulf %39, %38 : vector<8x16xf32>
    %41 = arith.truncf %31 : vector<8x8xf32> to vector<8x8xbf16>
    %cst_21 = arith.constant dense<0.000000e+00> : vector<8x16xf32>
    %42 = tpu.matmul %41, %11, %cst_21 {dimension_numbers = #tpu.dot_dimension_numbers<[1], [0], [0], [1], [0, 0, 1, 1], [], []>} : vector<8x8xbf16>, vector<8x16xbf16>, vector<8x16xf32> -> vector<8x16xf32>
    %43 = arith.addf %40, %42 : vector<8x16xf32>
    %c0_22 = arith.constant 0 : index
    %c0_23 = arith.constant 0 : index
    %44 = vector.load %arg8[%c0_22, %c0_23] : memref<8x16xf32, #tpu.memory_space<vmem>>, vector<8x16xf32>
    tpu.vector_store %arg8[%c0_22, %c0_23], %43 {strides = array<i32>} : memref<8x16xf32, #tpu.memory_space<vmem>>, vector<8x16xf32>,
    %c0_24 = arith.constant 0 : index
    %c0_25 = arith.constant 0 : index
    %45 = vector.load %arg6[%c0_24, %c0_25] : memref<8x1xf32, #tpu.memory_space<vmem>>, vector<8x1xf32>
    tpu.vector_store %arg6[%c0_24, %c0_25], %26 {strides = array<i32>} : memref<8x1xf32, #tpu.memory_space<vmem>>, vector<8x1xf32>,
    %c0_i32_26 = arith.constant 0 : i32
    %46 = arith.cmpi eq, %arg1, %c0_i32_26 : i32
    %47 = arith.extui %46 : i1 to i32
    %c0_i32_27 = arith.constant 0 : i32
    %48 = arith.cmpi ne, %47, %c0_i32_27 : i32
    scf.if %48 {
      %c0_28 = arith.constant 0 : index
      %c0_29 = arith.constant 0 : index
      %49 = vector.load %arg8[%c0_28, %c0_29] : memref<8x16xf32, #tpu.memory_space<vmem>>, vector<8x16xf32>
      %c0_30 = arith.constant 0 : index
      %c0_31 = arith.constant 0 : index
      %50 = vector.load %arg7[%c0_30, %c0_31] : memref<8x1xf32, #tpu.memory_space<vmem>>, vector<8x1xf32>
      %51 = tpu.reciprocal %50 {approx = true} : vector<8x1xf32> -> vector<8x1xf32>
      %52 = vector.broadcast %51 : vector<8x1xf32> to vector<8x16xf32>
      %53 = arith.mulf %49, %52 : vector<8x16xf32>
      %c0_32 = arith.constant 0 : index
      %c0_33 = arith.constant 0 : index
      %c0_34 = arith.constant 0 : index
      %54 = vector.load %arg5[%c0_32, %c0_33, %c0_34] : memref<1x8x16xf32, #tpu.memory_space<vmem>>, vector<1x8x16xf32>
      %55 = vector.shape_cast %54 : vector<1x8x16xf32> to vector<8x16xf32>
      %56 = vector.shape_cast %53 : vector<8x16xf32> to vector<1x8x16xf32>
      tpu.vector_store %arg5[%c0_32, %c0_33, %c0_34], %56 {strides = array<i32>} : memref<1x8x16xf32, #tpu.memory_space<vmem>>, vector<1x8x16xf32>,
    } else {
    }
    return
  }
  func.func @transform_0(%arg0: i32, %arg1: i32) -> (i32, i32, i32) {
    %c0_i32 = arith.constant 0 : i32
    %c0_i32_0 = arith.constant 0 : i32
    %c0_i32_1 = arith.constant 0 : i32
    return %arg0, %c0_i32, %c0_i32_0 : i32, i32, i32
  }
  func.func @transform_1(%arg0: i32, %arg1: i32) -> (i32, i32, i32) {
    %c0_i32 = arith.constant 0 : i32
    %c0_i32_0 = arith.constant 0 : i32
    return %arg0, %arg1, %c0_i32 : i32, i32, i32
  }
  func.func @transform_2(%arg0: i32, %arg1: i32) -> (i32, i32, i32) {
    %c0_i32 = arith.constant 0 : i32
    %c0_i32_0 = arith.constant 0 : i32
    return %arg0, %arg1, %c0_i32 : i32, i32, i32
  }
  func.func @transform_3(%arg0: i32, %arg1: i32) -> (i32, i32, i32) {
    %c0_i32 = arith.constant 0 : i32
    %c0_i32_0 = arith.constant 0 : i32
    %c0_i32_1 = arith.constant 0 : i32
    return %arg0, %c0_i32, %c0_i32_0 : i32, i32, i32
  }
}

module attributes {stable_mosaic.version = 11 : i64} {
  func.func @_matmul_kernel(%arg0: i32, %arg1: i32, %arg2: i32, %arg3: memref<16x64xf32, #tpu.memory_space<vmem>>, %arg4: memref<64x64xbf16, #tpu.memory_space<vmem>>, %arg5: memref<16x64xf32, #tpu.memory_space<vmem>>, %arg6: memref<16x64xf32, #tpu.memory_space<vmem>>) attributes {dimension_semantics = [#tpu.dimension_semantics<parallel>, #tpu.dimension_semantics<parallel>, #tpu.dimension_semantics<arbitrary>], iteration_bounds = array<i64: 1, 1, 1>, scalar_prefetch = 0 : i64, scratch_operands = 1 : i64, tpu.core_type = #tpu.core_type<tc>, window_params = [{transform_indices = @transform_0, window_bounds = array<i64: 16, 64>}, {transform_indices = @transform_1, window_bounds = array<i64: 64, 64>}, {transform_indices = @transform_2, window_bounds = array<i64: 16, 64>}]} {
    %c0_i32 = arith.constant 0 : i32
    %0 = arith.cmpi eq, %arg2, %c0_i32 : i32
    %1 = arith.extui %0 : i1 to i32
    %c0_i32_0 = arith.constant 0 : i32
    %2 = arith.cmpi ne, %1, %c0_i32_0 : i32
    scf.if %2 {
      %cst_10 = arith.constant 0.000000e+00 : f32
      %13 = vector.broadcast %cst_10 : f32 to vector<16x64xf32>
      %c0_11 = arith.constant 0 : index
      %c0_12 = arith.constant 0 : index
      %14 = vector.load %arg6[%c0_11, %c0_12] : memref<16x64xf32, #tpu.memory_space<vmem>>, vector<16x64xf32>
      tpu.vector_store %arg6[%c0_11, %c0_12], %13 {strides = array<i32>} : memref<16x64xf32, #tpu.memory_space<vmem>>, vector<16x64xf32>,
    } else {
    }
    %c0 = arith.constant 0 : index
    %c0_1 = arith.constant 0 : index
    %3 = vector.load %arg6[%c0, %c0_1] : memref<16x64xf32, #tpu.memory_space<vmem>>, vector<16x64xf32>
    %c0_2 = arith.constant 0 : index
    %c0_3 = arith.constant 0 : index
    %4 = vector.load %arg3[%c0_2, %c0_3] : memref<16x64xf32, #tpu.memory_space<vmem>>, vector<16x64xf32>
    %5 = arith.truncf %4 : vector<16x64xf32> to vector<16x64xbf16>
    %c0_4 = arith.constant 0 : index
    %c0_5 = arith.constant 0 : index
    %6 = vector.load %arg4[%c0_4, %c0_5] : memref<64x64xbf16, #tpu.memory_space<vmem>>, vector<64x64xbf16>
    %cst = arith.constant dense<0.000000e+00> : vector<16x64xf32>
    %7 = tpu.matmul %5, %6, %cst {dimension_numbers = #tpu.dot_dimension_numbers<[1], [0], [0], [1], [0, 0, 1, 1], [], []>} : vector<16x64xbf16>, vector<64x64xbf16>, vector<16x64xf32> -> vector<16x64xf32>
    %8 = arith.addf %3, %7 : vector<16x64xf32>
    %c0_6 = arith.constant 0 : index
    %c0_7 = arith.constant 0 : index
    %9 = vector.load %arg6[%c0_6, %c0_7] : memref<16x64xf32, #tpu.memory_space<vmem>>, vector<16x64xf32>
    tpu.vector_store %arg6[%c0_6, %c0_7], %8 {strides = array<i32>} : memref<16x64xf32, #tpu.memory_space<vmem>>, vector<16x64xf32>,
    %c0_i32_8 = arith.constant 0 : i32
    %10 = arith.cmpi eq, %arg2, %c0_i32_8 : i32
    %11 = arith.extui %10 : i1 to i32
    %c0_i32_9 = arith.constant 0 : i32
    %12 = arith.cmpi ne, %11, %c0_i32_9 : i32
    scf.if %12 {
      %c0_10 = arith.constant 0 : index
      %c0_11 = arith.constant 0 : index
      %13 = vector.load %arg6[%c0_10, %c0_11] : memref<16x64xf32, #tpu.memory_space<vmem>>, vector<16x64xf32>
      %c0_12 = arith.constant 0 : index
      %c0_13 = arith.constant 0 : index
      %14 = vector.load %arg5[%c0_12, %c0_13] : memref<16x64xf32, #tpu.memory_space<vmem>>, vector<16x64xf32>
      tpu.vector_store %arg5[%c0_12, %c0_13], %13 {strides = array<i32>} : memref<16x64xf32, #tpu.memory_space<vmem>>, vector<16x64xf32>,
    } else {
    }
    return
  }
  func.func @transform_0(%arg0: i32, %arg1: i32, %arg2: i32) -> (i32, i32) {
    %c0_i32 = arith.constant 0 : i32
    return %arg0, %arg2 : i32, i32
  }
  func.func @transform_1(%arg0: i32, %arg1: i32, %arg2: i32) -> (i32, i32) {
    %c0_i32 = arith.constant 0 : i32
    return %arg2, %arg1 : i32, i32
  }
  func.func @transform_2(%arg0: i32, %arg1: i32, %arg2: i32) -> (i32, i32) {
    %c0_i32 = arith.constant 0 : i32
    return %arg0, %arg1 : i32, i32
  }
}

module attributes {stable_mosaic.version = 11 : i64} {
  func.func @_ffn_kernel(%arg0: i32, %arg1: i32, %arg2: memref<16x64xf32, #tpu.memory_space<vmem>>, %arg3: memref<1x64xf32, #tpu.memory_space<vmem>>, %arg4: memref<64x128xbf16, #tpu.memory_space<vmem>>, %arg5: memref<64x128xbf16, #tpu.memory_space<vmem>>, %arg6: memref<128x64xbf16, #tpu.memory_space<vmem>>, %arg7: memref<16x64xf32, #tpu.memory_space<vmem>>, %arg8: memref<16x64xbf16, #tpu.memory_space<vmem>>, %arg9: memref<16x64xf32, #tpu.memory_space<vmem>>) attributes {dimension_semantics = [#tpu.dimension_semantics<parallel>, #tpu.dimension_semantics<arbitrary>], iteration_bounds = array<i64: 1, 1>, scalar_prefetch = 0 : i64, scratch_operands = 2 : i64, tpu.core_type = #tpu.core_type<tc>, window_params = [{transform_indices = @transform_0, window_bounds = array<i64: 16, 64>}, {pipeline_mode = #tpu.pipeline_mode<synchronous>, transform_indices = @transform_1, window_bounds = array<i64: 1, 64>}, {transform_indices = @transform_2, window_bounds = array<i64: 64, 128>}, {transform_indices = @transform_3, window_bounds = array<i64: 64, 128>}, {transform_indices = @transform_4, window_bounds = array<i64: 128, 64>}, {transform_indices = @transform_5, window_bounds = array<i64: 16, 64>}]} {
    %c0_i32 = arith.constant 0 : i32
    %0 = arith.cmpi eq, %arg1, %c0_i32 : i32
    %1 = arith.extui %0 : i1 to i32
    %c0_i32_0 = arith.constant 0 : i32
    %2 = arith.cmpi ne, %1, %c0_i32_0 : i32
    scf.if %2 {
      %c0_17 = arith.constant 0 : index
      %c0_18 = arith.constant 0 : index
      %24 = vector.load %arg2[%c0_17, %c0_18] : memref<16x64xf32, #tpu.memory_space<vmem>>, vector<16x64xf32>
      %25 = arith.mulf %24, %24 : vector<16x64xf32>
      %cst_19 = arith.constant dense<0.000000e+00> : vector<16xf32>
      %26 = vector.multi_reduction <add>, %25, %cst_19 [1] : vector<16x64xf32> to vector<16xf32>
      %27 = vector.shape_cast %26 : vector<16xf32> to vector<16x1xf32>
      %cst_20 = arith.constant 6.400000e+01 : f32
      %28 = vector.broadcast %cst_20 : f32 to vector<16x1xf32>
      %29 = arith.divf %27, %28 : vector<16x1xf32>
      %cst_21 = arith.constant 9.99999974E-6 : f32
      %30 = vector.broadcast %cst_21 : f32 to vector<16x1xf32>
      %31 = arith.addf %29, %30 : vector<16x1xf32>
      %32 = math.rsqrt %31 : vector<16x1xf32>
      %33 = vector.broadcast %32 : vector<16x1xf32> to vector<16x64xf32>
      %34 = arith.mulf %24, %33 : vector<16x64xf32>
      %c0_22 = arith.constant 0 : index
      %c0_23 = arith.constant 0 : index
      %35 = vector.load %arg3[%c0_22, %c0_23] : memref<1x64xf32, #tpu.memory_space<vmem>>, vector<1x64xf32>
      %36 = vector.broadcast %35 : vector<1x64xf32> to vector<16x64xf32>
      %37 = arith.mulf %34, %36 : vector<16x64xf32>
      %38 = arith.truncf %37 : vector<16x64xf32> to vector<16x64xbf16>
      %c0_24 = arith.constant 0 : index
      %c0_25 = arith.constant 0 : index
      %39 = vector.load %arg8[%c0_24, %c0_25] : memref<16x64xbf16, #tpu.memory_space<vmem>>, vector<16x64xbf16>
      tpu.vector_store %arg8[%c0_24, %c0_25], %38 {strides = array<i32>} : memref<16x64xbf16, #tpu.memory_space<vmem>>, vector<16x64xbf16>,
      %cst_26 = arith.constant 0.000000e+00 : f32
      %40 = vector.broadcast %cst_26 : f32 to vector<16x64xf32>
      %c0_27 = arith.constant 0 : index
      %c0_28 = arith.constant 0 : index
      %41 = vector.load %arg9[%c0_27, %c0_28] : memref<16x64xf32, #tpu.memory_space<vmem>>, vector<16x64xf32>
      tpu.vector_store %arg9[%c0_27, %c0_28], %40 {strides = array<i32>} : memref<16x64xf32, #tpu.memory_space<vmem>>, vector<16x64xf32>,
    } else {
    }
    %c0 = arith.constant 0 : index
    %c0_1 = arith.constant 0 : index
    %3 = vector.load %arg8[%c0, %c0_1] : memref<16x64xbf16, #tpu.memory_space<vmem>>, vector<16x64xbf16>
    %c0_2 = arith.constant 0 : index
    %c0_3 = arith.constant 0 : index
    %4 = vector.load %arg4[%c0_2, %c0_3] : memref<64x128xbf16, #tpu.memory_space<vmem>>, vector<64x128xbf16>
    %cst = arith.constant dense<0.000000e+00> : vector<16x128xf32>
    %5 = tpu.matmul %3, %4, %cst {dimension_numbers = #tpu.dot_dimension_numbers<[1], [0], [0], [1], [0, 0, 1, 1], [], []>} : vector<16x64xbf16>, vector<64x128xbf16>, vector<16x128xf32> -> vector<16x128xf32>
    %c0_4 = arith.constant 0 : index
    %c0_5 = arith.constant 0 : index
    %6 = vector.load %arg5[%c0_4, %c0_5] : memref<64x128xbf16, #tpu.memory_space<vmem>>, vector<64x128xbf16>
    %cst_6 = arith.constant dense<0.000000e+00> : vector<16x128xf32>
    %7 = tpu.matmul %3, %6, %cst_6 {dimension_numbers = #tpu.dot_dimension_numbers<[1], [0], [0], [1], [0, 0, 1, 1], [], []>} : vector<16x64xbf16>, vector<64x128xbf16>, vector<16x128xf32> -> vector<16x128xf32>
    %8 = arith.negf %5 : vector<16x128xf32>
    %9 = math.exp %8 : vector<16x128xf32>
    %cst_7 = arith.constant 1.000000e+00 : f32
    %10 = vector.broadcast %cst_7 : f32 to vector<16x128xf32>
    %11 = arith.addf %10, %9 : vector<16x128xf32>
    %12 = arith.divf %10, %11 : vector<16x128xf32>
    %13 = arith.mulf %5, %12 : vector<16x128xf32>
    %14 = arith.mulf %13, %7 : vector<16x128xf32>
    %c0_8 = arith.constant 0 : index
    %c0_9 = arith.constant 0 : index
    %15 = vector.load %arg9[%c0_8, %c0_9] : memref<16x64xf32, #tpu.memory_space<vmem>>, vector<16x64xf32>
    %16 = arith.truncf %14 : vector<16x128xf32> to vector<16x128xbf16>
    %c0_10 = arith.constant 0 : index
    %c0_11 = arith.constant 0 : index
    %17 = vector.load %arg6[%c0_10, %c0_11] : memref<128x64xbf16, #tpu.memory_space<vmem>>, vector<128x64xbf16>
    %cst_12 = arith.constant dense<0.000000e+00> : vector<16x64xf32>
    %18 = tpu.matmul %16, %17, %cst_12 {dimension_numbers = #tpu.dot_dimension_numbers<[1], [0], [0], [1], [0, 0, 1, 1], [], []>} : vector<16x128xbf16>, vector<128x64xbf16>, vector<16x64xf32> -> vector<16x64xf32>
    %19 = arith.addf %15, %18 : vector<16x64xf32>
    %c0_13 = arith.constant 0 : index
    %c0_14 = arith.constant 0 : index
    %20 = vector.load %arg9[%c0_13, %c0_14] : memref<16x64xf32, #tpu.memory_space<vmem>>, vector<16x64xf32>
    tpu.vector_store %arg9[%c0_13, %c0_14], %19 {strides = array<i32>} : memref<16x64xf32, #tpu.memory_space<vmem>>, vector<16x64xf32>,
    %c0_i32_15 = arith.constant 0 : i32
    %21 = arith.cmpi eq, %arg1, %c0_i32_15 : i32
    %22 = arith.extui %21 : i1 to i32
    %c0_i32_16 = arith.constant 0 : i32
    %23 = arith.cmpi ne, %22, %c0_i32_16 : i32
    scf.if %23 {
      %c0_17 = arith.constant 0 : index
      %c0_18 = arith.constant 0 : index
      %24 = vector.load %arg9[%c0_17, %c0_18] : memref<16x64xf32, #tpu.memory_space<vmem>>, vector<16x64xf32>
      %c0_19 = arith.constant 0 : index
      %c0_20 = arith.constant 0 : index
      %25 = vector.load %arg7[%c0_19, %c0_20] : memref<16x64xf32, #tpu.memory_space<vmem>>, vector<16x64xf32>
      tpu.vector_store %arg7[%c0_19, %c0_20], %24 {strides = array<i32>} : memref<16x64xf32, #tpu.memory_space<vmem>>, vector<16x64xf32>,
    } else {
    }
    return
  }
  func.func @transform_0(%arg0: i32, %arg1: i32) -> (i32, i32) {
    %c0_i32 = arith.constant 0 : i32
    %c0_i32_0 = arith.constant 0 : i32
    return %arg0, %c0_i32 : i32, i32
  }
  func.func @transform_1(%arg0: i32, %arg1: i32) -> (i32, i32) {
    %c0_i32 = arith.constant 0 : i32
    %c0_i32_0 = arith.constant 0 : i32
    %c0_i32_1 = arith.constant 0 : i32
    return %c0_i32, %c0_i32_0 : i32, i32
  }
  func.func @transform_2(%arg0: i32, %arg1: i32) -> (i32, i32) {
    %c0_i32 = arith.constant 0 : i32
    %c0_i32_0 = arith.constant 0 : i32
    return %c0_i32, %arg1 : i32, i32
  }
  func.func @transform_3(%arg0: i32, %arg1: i32) -> (i32, i32) {
    %c0_i32 = arith.constant 0 : i32
    %c0_i32_0 = arith.constant 0 : i32
    return %c0_i32, %arg1 : i32, i32
  }
  func.func @transform_4(%arg0: i32, %arg1: i32) -> (i32, i32) {
    %c0_i32 = arith.constant 0 : i32
    %c0_i32_0 = arith.constant 0 : i32
    return %arg1, %c0_i32 : i32, i32
  }
  func.func @transform_5(%arg0: i32, %arg1: i32) -> (i32, i32) {
    %c0_i32 = arith.constant 0 : i32
    %c0_i32_0 = arith.constant 0 : i32
    return %arg0, %c0_i32 : i32, i32
  }
}

module attributes {stable_mosaic.version = 11 : i64} {
  func.func @_lmhead_kernel(%arg0: i32, %arg1: memref<2x64xf32, #tpu.memory_space<vmem>>, %arg2: memref<1x64xf32, #tpu.memory_space<vmem>>, %arg3: memref<256x64xbf16, #tpu.memory_space<vmem>>, %arg4: memref<2x256xf32, #tpu.memory_space<vmem>>) attributes {dimension_semantics = [#tpu.dimension_semantics<parallel>], iteration_bounds = array<i64: 1>, scalar_prefetch = 0 : i64, scratch_operands = 0 : i64, tpu.core_type = #tpu.core_type<tc>, window_params = [{pipeline_mode = #tpu.pipeline_mode<synchronous>, transform_indices = @transform_0, window_bounds = array<i64: 2, 64>}, {pipeline_mode = #tpu.pipeline_mode<synchronous>, transform_indices = @transform_1, window_bounds = array<i64: 1, 64>}, {transform_indices = @transform_2, window_bounds = array<i64: 256, 64>}, {transform_indices = @transform_3, window_bounds = array<i64: 2, 256>}]} {
    %c0 = arith.constant 0 : index
    %c0_0 = arith.constant 0 : index
    %0 = vector.load %arg1[%c0, %c0_0] : memref<2x64xf32, #tpu.memory_space<vmem>>, vector<2x64xf32>
    %1 = arith.mulf %0, %0 : vector<2x64xf32>
    %cst = arith.constant dense<0.000000e+00> : vector<2xf32>
    %2 = vector.multi_reduction <add>, %1, %cst [1] : vector<2x64xf32> to vector<2xf32>
    %3 = vector.shape_cast %2 : vector<2xf32> to vector<2x1xf32>
    %cst_1 = arith.constant 6.400000e+01 : f32
    %4 = vector.broadcast %cst_1 : f32 to vector<2x1xf32>
    %5 = arith.divf %3, %4 : vector<2x1xf32>
    %cst_2 = arith.constant 9.99999974E-6 : f32
    %6 = vector.broadcast %cst_2 : f32 to vector<2x1xf32>
    %7 = arith.addf %5, %6 : vector<2x1xf32>
    %8 = math.rsqrt %7 : vector<2x1xf32>
    %9 = vector.broadcast %8 : vector<2x1xf32> to vector<2x64xf32>
    %10 = arith.mulf %0, %9 : vector<2x64xf32>
    %c0_3 = arith.constant 0 : index
    %c0_4 = arith.constant 0 : index
    %11 = vector.load %arg2[%c0_3, %c0_4] : memref<1x64xf32, #tpu.memory_space<vmem>>, vector<1x64xf32>
    %12 = vector.broadcast %11 : vector<1x64xf32> to vector<2x64xf32>
    %13 = arith.mulf %10, %12 : vector<2x64xf32>
    %14 = arith.truncf %13 : vector<2x64xf32> to vector<2x64xbf16>
    %c0_5 = arith.constant 0 : index
    %c0_6 = arith.constant 0 : index
    %15 = vector.load %arg3[%c0_5, %c0_6] : memref<256x64xbf16, #tpu.memory_space<vmem>>, vector<256x64xbf16>
    %cst_7 = arith.constant dense<0.000000e+00> : vector<2x256xf32>
    %16 = tpu.matmul %14, %15, %cst_7 {dimension_numbers = #tpu.dot_dimension_numbers<[1], [1], [0], [0], [0, 0, 1, 0], [], []>} : vector<2x64xbf16>, vector<256x64xbf16>, vector<2x256xf32> -> vector<2x256xf32>
    %c0_8 = arith.constant 0 : index
    %c0_9 = arith.constant 0 : index
    %17 = vector.load %arg4[%c0_8, %c0_9] : memref<2x256xf32, #tpu.memory_space<vmem>>, vector<2x256xf32>
    tpu.vector_store %arg4[%c0_8, %c0_9], %16 {strides = array<i32>} : memref<2x256xf32, #tpu.memory_space<vmem>>, vector<2x256xf32>,
    return
  }
  func.func @transform_0(%arg0: i32) -> (i32, i32) {
    %c0_i32 = arith.constant 0 : i32
    %c0_i32_0 = arith.constant 0 : i32
    %c0_i32_1 = arith.constant 0 : i32
    return %c0_i32, %c0_i32_0 : i32, i32
  }
  func.func @transform_1(%arg0: i32) -> (i32, i32) {
    %c0_i32 = arith.constant 0 : i32
    %c0_i32_0 = arith.constant 0 : i32
    %c0_i32_1 = arith.constant 0 : i32
    return %c0_i32, %c0_i32_0 : i32, i32
  }
  func.func @transform_2(%arg0: i32) -> (i32, i32) {
    %c0_i32 = arith.constant 0 : i32
    %c0_i32_0 = arith.constant 0 : i32
    return %arg0, %c0_i32 : i32, i32
  }
  func.func @transform_3(%arg0: i32) -> (i32, i32) {
    %c0_i32 = arith.constant 0 : i32
    %c0_i32_0 = arith.constant 0 : i32
    return %c0_i32, %arg0 : i32, i32
  }
}

</mosaic_0001>

<bundles_post_ra>
// kernel: gpt_forward.9
= control target key start
LH: loop header
LB: loop body
LE: loop exit
PB: predicated region body
PF: predicated region fallthrough
CT: control target
= control target key end

     0   :  { %vm19_vm0 = vcmask 523264   ;;  %v203_v6 = vmov 64.0   ;;  %s309_s0 = inlined_call_operand.vmem [shape: f32[16,64], index: 0, kind: input, shape index: {}]   ;;  %s310_s1 = inlined_call_operand.vmem [shape: f32[1,64], index: 1, kind: input, shape index: {}]   ;;  %s311_s2 = inlined_call_operand.vmem [shape: bf16[64,192], index: 2, kind: input, shape index: {}]   ;;  %s312_s3 = inlined_call_operand.vmem [shape: f32[16,192], index: 3, kind: output, shape index: {}]  }
   0x1   :  { %v227_v0 = vld [vmem:[%s309_s0] sm:$0xff]  ;;  %v234_v2 = vld [vmem:[%s309_s0 + $0x8] sm:$0xff]  ;;  %197 = vrcp.f32 %v203_v6  ;;  %v179_v10 = vld [vmem:[%s311_s2 + $0x30] sm:$0xf] }
   0x2   :  { %v17_v1 = vmul.f32 %v227_v0, %v227_v0  ;;  %v18_v4 = vmul.f32 %v234_v2, %v234_v2  ;;  %v194_v11 = vld [vmem:[%s311_s2 + $0x34] sm:$0xf0]  ;;  %v193_v12 = vld [vmem:[%s311_s2 + $0x34] sm:$0xf]  ;;  %v181_v14 = vld [vmem:[%s311_s2 + $0x38] sm:$0xf0] }
   0x3   :  { %v180_v13 = vor.u32 %v194_v11, %v179_v10  ;;  %v184_v15 = vor.u32 %v193_v12, %v181_v14  ;;  %v171_v17 = vld [vmem:[%s311_s2 + $0x20] sm:$0xf]  ;;  %v192_v18 = vld [vmem:[%s311_s2 + $0x24] sm:$0xf0]  ;;  %v191_v19 = vld [vmem:[%s311_s2 + $0x24] sm:$0xf] }
   0x4   :  { %v20_v3 = vsel %vm19_vm0, %v17_v1, 0.0  ;;  %v23_v5 = vsel %vm19_vm0, %v18_v4, 0.0  ;;  %v172_v20 = vor.u32 %v192_v18, %v171_v17  ;;  %v173_v21 = vld [vmem:[%s311_s2 + $0x28] sm:$0xf0]  ;;  %v163_v24 = vld [vmem:[%s311_s2 + $0x10] sm:$0xf] }
   0x5   :  { %21 = vadd.xlane.f32.xlu0 %v20_v3  ;;  %121 = vmatpush.bf16.msra.mxu0 %v180_v13  ;;  %v176_v22 = vor.u32 %v191_v19, %v173_v21  ;;  %v190_v25 = vld [vmem:[%s311_s2 + $0x14] sm:$0xf0]  ;;  %v189_v26 = vld [vmem:[%s311_s2 + $0x14] sm:$0xf]  ;;  %v165_v28 = vld [vmem:[%s311_s2 + $0x18] sm:$0xf0] }
   0x6   :  { %135 = vmatpush.bf16.msra.mxu1 %v184_v15  ;;  %v164_v27 = vor.u32 %v190_v25, %v163_v24  ;;  %v168_v29 = vor.u32 %v189_v26, %v165_v28  ;;  %v155_v31 = vld [vmem:[%s311_s2] sm:$0xf]  ;;  %v188_v32 = vld [vmem:[%s311_s2 + $0x4] sm:$0xf0]  ;;  %v187_v33 = vld [vmem:[%s311_s2 + $0x4] sm:$0xf] }
   0x7   :  { %v198_v7 = vpop.eup %197  ;;  %v156_v34 = vor.u32 %v188_v32, %v155_v31  ;;  %v157_v35 = vld [vmem:[%s311_s2 + $0x8] sm:$0xf0]  ;;  %v196_v57 = vld [vmem:[%s310_s1] ss:$0 sm:$0xff] }
   0x8   :  { %v27_v8 = vmul.f32 64.0, %v198_v7  ;;  %vm31_vm1 = vweird.f32 %v198_v7  ;;  %v160_v37 = vor.u32 %v187_v33, %v157_v35 }
   0x9   :  { %122 = vmatpush.bf16.msra.mxu0 %v172_v20 }
   0xa   :  { %v28_v9 = vsub.f32 1.0, %v27_v8  ;;  %136 = vmatpush.bf16.msra.mxu1 %v176_v22 }
   0xc   :  { %v29_v16 = vmul.f32 %v198_v7, %v28_v9 }
   0xd   :  { %24 = vadd.xlane.f32.xlu0 %v23_v5  ;;  %123 = vmatpush.bf16.msra.mxu0 %v164_v27 }
   0xe   :  { %v30_v23 = vadd.f32 %v198_v7, %v29_v16  ;;  %137 = vmatpush.bf16.msra.mxu1 %v168_v29 }
  0x10   :  { %v32_v30 = vsel %vm31_vm1, %v198_v7, %v30_v23 }
  0x11   :  { %124 = vmatpush.bf16.msra.mxu0 %v156_v34 }
  0x12   :  { %138 = vmatpush.bf16.msra.mxu1 %v160_v37 }
  0x78   :  { %v22_v36 = vpop.xlane.xlu0 %21 }
  0x79   :  { %v33_v38 = vmul.f32 %v32_v30, %v22_v36 }
  0x7b   :  { %v35_v39 = vadd.f32 1e-05, %v33_v38 }
  0x7d   :  { %199 = vrsqrt.f32 %v35_v39  ;;  %vm43_vm3 = vweird.f32 %v35_v39 }
  0x80   :  { %v25_v40 = vpop.xlane.xlu0 %24 }
  0x81   :  { %v34_v41 = vmul.f32 %v32_v30, %v25_v40 }
  0x83   :  { %v200_v42 = vpop.eup %199  ;;  %v36_v43 = vadd.f32 1e-05, %v34_v41 }
  0x84   :  { %v38_v44 = vmul.f32 %v200_v42, %v35_v39  ;;  %vm44_vm2 = vweird.f32 %v200_v42 }
  0x85   :  { %201 = vrsqrt.f32 %v36_v43  ;;  %vm45_vm4 = vmor %vm43_vm3, %vm44_vm2  ;;  %vm53_vm6 = vweird.f32 %v36_v43 }
  0x86   :  { %v39_v45 = vmul.f32 %v200_v42, %v38_v44 }
  0x88   :  { %v40_v46 = vmul.f32 0.5, %v39_v45 }
  0x8a   :  { %v41_v47 = vsub.f32 1.5, %v40_v46 }
  0x8b   :  { %v202_v48 = vpop.eup %201 }
  0x8c   :  { %v48_v49 = vmul.f32 %v202_v48, %v36_v43  ;;  %v42_v50 = vmul.f32 %v200_v42, %v41_v47  ;;  %vm54_vm5 = vweird.f32 %v202_v48 }
  0x8d   :  { %vm55_vm7 = vmor %vm53_vm6, %vm54_vm5 }
  0x8e   :  { %v49_v51 = vmul.f32 %v202_v48, %v48_v49  ;;  %v46_v53 = vsel %vm45_vm4, %v200_v42, %v42_v50 }
  0x8f   :  { %v57_v56 = vmul.f32 %v46_v53, %v227_v0 }
  0x90   :  { %v50_v52 = vmul.f32 0.5, %v49_v51 }
  0x91   :  { %v63_v60 = vmul.f32 %v196_v57, %v57_v56 }
  0x92   :  { %v51_v54 = vsub.f32 1.5, %v50_v52 }
  0x94   :  { %v52_v55 = vmul.f32 %v202_v48, %v51_v54 }
  0x96   :  { %v56_v58 = vsel %vm55_vm7, %v202_v48, %v52_v55 }
  0x97   :  { %v58_v59 = vmul.f32 %v56_v58, %v234_v2 }
  0x99   :  { %v64_v61 = vmul.f32 %v196_v57, %v58_v59 }
  0x9b   :  { %v65_v62 = vpack.c.bf16 %v64_v61, %v63_v60 }
  0x9d   :  { %185 = vmatmul.msk.bf16.vlgmr.msra.gmra.mxu0 %vm19_vm0, %v65_v62  ;;  %186 = vmatmul.msk.bf16.vlgmr.msra.gmra.mxu1 %vm19_vm0, %v65_v62 }
 0x11a   :  { %v126_v63 = vpop.f32.mrf.mxu0  ;;  %v140_v1 = vpop.f32.mrf.mxu1 }
 0x11b   :  { %145 = vst [vmem:[%s312_s3] sm:$0xff] %v126_v63 }
 0x11c   :  { %146 = vst.msk [vmem:[%s312_s3 + $0x8] sm:$0xff] %vm19_vm0, %v140_v1 }
 0x122   :  { %v128_v0 = vpop.f32.mrf.mxu0  ;;  %v142_v2 = vpop.f32.mrf.mxu1 }
 0x123   :  { %147 = vst [vmem:[%s312_s3 + $0x10] sm:$0xff] %v128_v0 }
 0x124   :  { %148 = vst.msk [vmem:[%s312_s3 + $0x18] sm:$0xff] %vm19_vm0, %v142_v2 }

// kernel: gpt_forward.10
= control target key start
LH: loop header
LB: loop body
LE: loop exit
PB: predicated region body
PF: predicated region fallthrough
CT: control target
= control target key end

     0   :  { %s536_s12 = smov 0   ;;  %s538_s13 = smov 0   ;;  %s593_s0 = inlined_call_operand.vmem [shape: f32[8,8,16], index: 0, kind: input, shape index: {}]   ;;  %s594_s1 = inlined_call_operand.vmem [shape: f32[8,8,16], index: 1, kind: input, shape index: {}]   ;;  %s595_s2 = inlined_call_operand.vmem [shape: f32[8,8,16], index: 2, kind: input, shape index: {}]   ;;  %s596_s3 = inlined_call_operand.vmem [shape: f32[8,8,16], index: 3, kind: output, shape index: {}]  }
   0x1   :  { %s540_s14 = smov 0  }
   0x2 LB: > { %s25_s15 = sadd.s32 1, %s507_s13  ;;  %p444_p0 = scmp.ge.s32.totalorder %s511_s14, 1  ;;  %s511_s14 = sphi %s540_s14, %s13_s14   ;;  %s507_s13 = sphi %s538_s13, %s598_s13   ;;  %s503_s12 = sphi %s536_s12, %s597_s12  }
   0x3   : > { %p27_p1 = scmp.ge.s32.totalorder %s25_s15, 8  ;;  %p176_p2 = scmp.lt.s32.totalorder %s511_s14, 9 }
   0x5   : > { %s600_s15 = smov (%p27_p1, %s25_s15), 0  ;;  %p177_p3 = pnand %p444_p0, %p176_p2 }
   0x6   : > { %p212_p4 = scmp.lt.s32.totalorder (!%p177_p3), %s503_s12, 7 }
   0x7   : > { %180 = sbr.rel (%p177_p3) target bundleno = 628 (0x274), region = 32 }
   0xc   : > { %s602_s12 = smov (!%p212_p4, %s503_s12), 7  ;;  %vm242_vm0 = vcmask 130048   ;;  %vm239_vm1 = vcmask 7168   ;;  %v513_v5 = vmov -1e+30   ;;  %v271_v6 = vlaneseq }
   0xd   : > { %s554_s16 = sshll.u32 %s602_s12, 3  ;;  %240 = vst.msk [vmem:[#allocation2] sm:$0xff] %vm239_vm1, %v513_v5  ;;  %vm281_vm3 = vcmask 64512   ;;  %v514_v14 = vmov 0   ;;  %v515_v15 = vmov 0.0   ;;  %vm316_vm4 = vcmask 1043456  }
   0xe   : > { %s222_s19 = scalar_lea.vmem %s594_s1, %s554_s16  ;;  %s215_s22 = scalar_lea.vmem %s593_s0, %s554_s16  ;;  %v272_v7 = vshrl.u32 %v271_v6, 7  ;;  %v274_v8 = vand.u32 127, %v271_v6  ;;  %480 = vset.pattern.permute.xlu0 %v514_v14  ;;  %481 = vset.pattern.permute.xlu1 %v514_v14  ;;  %241 = vst.msk [vmem:[#allocation3] sm:$0xff] %vm239_vm1, %v515_v15 }
   0xf   : > { %v246_v0 = vld [vmem:[%s222_s19] sm:$0xff]  ;;  %482 = vset.pattern.permute.xlu2 %v514_v14  ;;  %243 = vst.msk [vmem:[#allocation4] sm:$0xff] %vm242_vm0, %v515_v15  ;;  %s229_s25 = scalar_lea.vmem %s595_s2, %s554_s16  ;;  %s233_s28 = scalar_lea.vmem %s596_s3, %s554_s16 }
  0x10   : > { %v247_v1 = vpack.c.bf16 %v246_v0, %v246_v0  ;;  %v244_v3 = vld [vmem:[%s215_s22] sm:$0xff]  ;;  %vm278_vm2 = vcmp.le.s32.totalorder %v274_v8, %v272_v7 }
  0x11   : > { %v245_v4 = vpack.c.bf16 %v244_v3, %v244_v3  ;;  %v248_v20 = vld [vmem:[%s229_s25] sm:$0xff] }
  0x12   : > { %v255_v2 = vsel %vm242_vm0, %v247_v1, 0  ;;  %v249_v21 = vpack.c.bf16 %v248_v20, %v248_v20 }
  0x13   : > { %264 = vmatpush.bf16.xpose.msra.mxu0 %v255_v2 }
  0x14   : > { %v280_v16 = vld [vmem:[#allocation2] sm:$0xff]  ;;  %v318_v22 = vsel %vm316_vm4, %v249_v21, 0 }
  0x15   : > { %327 = vmatpush.bf16.msra.mxu1 %v318_v22  ;;  %v297_v31 = vld [vmem:[#allocation3] sm:$0xff] }
  0x16   : > { %v305_v39 = vld [vmem:[#allocation4] sm:$0xff] }
  0x1a   : > { %449 = vmatmul.msk.bf16.vlgmr.msra.gmra.mxu0 %vm242_vm0, %v245_v4 }
  0x97   : > { %v266_v9 = vpop.f32.mrf.mxu0 }
  0x98   : > { %v270_v10 = vmul.f32 0.25, %v266_v9 }
  0x9a   : > { %v279_v11 = vsel %vm278_vm2, %v270_v10, -1e+30 }
  0x9b   : > { %v282_v12 = vsel %vm281_vm3, %v279_v11, -inf }
  0x9c   : > { %283 = vmax.xlane.f32.xlu0 %v282_v12 }
  0x9f   : > { %v268_v13 = vpop.f32.mrf.mxu0 }
 0x10f   : > { %v284_v17 = vpop.xlane.xlu0 %283 }
 0x110   : > { %v285_v18 = vmax.f32 %v280_v16, %v284_v17 }
 0x112   : > { %v286_v19 = vsub.f32 %v280_v16, %v285_v18  ;;  %335 = vst.msk [vmem:[#allocation2] sm:$0xff] %vm239_vm1, %v285_v18  ;;  %291 = vperm.xlu0 %480, %v285_v18  }
 0x114   : > { %v287_v29 = vmul.f32 1.442695, %v286_v19 }
 0x184   : > { %v292_v23 = vpop.permute.xlu0 %291 }
 0x185   : > { %v294_v24 = vsub.f32 %v279_v11, %v292_v23 }
 0x187   : > { %v295_v25 = vmul.f32 1.442695, %v294_v24 }
 0x189   : > { %483 = vpow2.f32 %v295_v25 }
 0x18a   : > { %485 = vpow2.f32 %v287_v29 }
 0x18f   : > { %v484_v26 = vpop.eup %483 }
 0x190   : > { %v299_v27 = vsel %vm281_vm3, %v484_v26, 0.0  ;;  %v312_v28 = vpack.c.bf16 %v484_v26, %v484_v26  ;;  %v486_v30 = vpop.eup %485 }
 0x191   : > { %300 = vadd.xlane.f32.xlu1 %v299_v27  ;;  %v298_v32 = vmul.f32 %v486_v30, %v297_v31 }
 0x192   : > { %450 = vmatmul.msk.bf16.vlgmr.msra.gmra.mxu1 %vm281_vm3, %v312_v28 }
 0x1aa   : > { %308 = vperm.xlu1 %481, %v486_v30  }
 0x204   : > { %v301_v33 = vpop.xlane.xlu1 %300 }
 0x205   : > { %v302_v34 = vadd.f32 %v301_v33, %v298_v32 }
 0x207   : > { %304 = vst.msk [vmem:[#allocation3] sm:$0xff] %vm239_vm1, %v302_v34 }
 0x20e   : > { %v340_v35 = vld [vmem:[#allocation3] sm:$0xff] }
 0x20f   : > { %v329_v36 = vpop.f32.mrf.mxu1  ;;  %487 = vrcp.f32 %v340_v35 }
 0x215   : > { %v488_v37 = vpop.eup %487 }
 0x216   : > { %344 = vperm.xlu2 %482, %v488_v37  }
 0x217   : > { %v331_v38 = vpop.f32.mrf.mxu1 }
 0x21c   : > { %v309_v40 = vpop.permute.xlu1 %308 }
 0x21d   : > { %v311_v41 = vmul.f32 %v309_v40, %v305_v39 }
 0x21f   : > { %v333_v42 = vadd.f32 %v329_v36, %v311_v41 }
 0x221   : > { %334 = vst.msk [vmem:[#allocation4] sm:$0xff] %vm242_vm0, %v333_v42 }
 0x228   : > { %v339_v43 = vld [vmem:[#allocation4] sm:$0xff] }
 0x270   : > { %v345_v44 = vpop.permute.xlu2 %344 }
 0x271   : > { %v347_v45 = vmul.f32 %v345_v44, %v339_v43 }
 0x273   : > { %348 = vst.msk [vmem:[%s233_s28] sm:$0xff] %vm242_vm0, %v347_v45 }
 0x274 PF: > { %s13_s14 = sadd.s32 1, %s511_s14   ;;  %s597_s12 = smov %s507_s13 }
 0x275   : > { %p10_p5 = scmp.ge.s32.totalorder %s13_s14, 10   ;;  %s598_s13 = smov %s600_s15 }
 0x277   :  { %12 = sbr.rel (!%p10_p5) target bundleno = 2 (0x2), region = 76 }

// kernel: gpt_forward.11
= control target key start
LH: loop header
LB: loop body
LE: loop exit
PB: predicated region body
PF: predicated region fallthrough
CT: control target
= control target key end

     0   :  { %vm16_vm0 = vcmask 523264   ;;  %v111_v1 = vmov 0.0   ;;  %s158_s1 = inlined_call_operand.vmem [shape: bf16[64,64], index: 1, kind: input, shape index: {}]   ;;  %s159_s0 = inlined_call_operand.vmem [shape: f32[16,64], index: 0, kind: input, shape index: {}]   ;;  %s160_s2 = inlined_call_operand.vmem [shape: f32[16,64], index: 2, kind: output, shape index: {}]  }
   0x1   :  { %v109_v0 = vld [vmem:[%s158_s1 + $0x18] sm:$0xff]  ;;  %17 = vst.msk [vmem:[#allocation2] sm:$0xff] %vm16_vm0, %v111_v1  ;;  %v108_v2 = vld [vmem:[%s158_s1 + $0x10] sm:$0xff]  ;;  %v107_v3 = vld [vmem:[%s158_s1 + $0x8] sm:$0xff] }
   0x2   :  { %18 = vst.msk [vmem:[#allocation2 + $0x8] sm:$0xff] %vm16_vm0, %v111_v1  ;;  %64 = vmatpush.bf16.msra.mxu0 %v109_v0  ;;  %v106_v4 = vld [vmem:[%s158_s1] sm:$0xff]  ;;  %v22_v6 = vld [vmem:[%s159_s0 + $0x8] sm:$0xff] }
   0x3   :  { %v21_v5 = vld [vmem:[%s159_s0] sm:$0xff] }
   0x4   :  { %v23_v7 = vpack.c.bf16 %v22_v6, %v21_v5 }
   0x6   :  { %65 = vmatpush.bf16.msra.mxu0 %v108_v2 }
   0x8   :  { %v19_v8 = vld [vmem:[#allocation2] sm:$0xff] }
   0x9   :  { %v20_v11 = vld [vmem:[#allocation2 + $0x8] sm:$0xff] }
   0xa   :  { %66 = vmatpush.bf16.msra.mxu0 %v107_v3 }
   0xe   :  { %67 = vmatpush.bf16.msra.mxu0 %v106_v4 }
  0x11   :  { %105 = vmatmul.msk.bf16.vlgmr.msra.gmra.mxu0 %vm16_vm0, %v23_v7 }
  0x8e   :  { %v69_v9 = vpop.f32.mrf.mxu0 }
  0x8f   :  { %v74_v10 = vadd.f32 %v69_v9, %v19_v8 }
  0x91   :  { %76 = vst.msk [vmem:[#allocation2] sm:$0xff] %vm16_vm0, %v74_v10 }
  0x96   :  { %v71_v12 = vpop.f32.mrf.mxu0 }
  0x97   :  { %v75_v13 = vadd.f32 %v71_v12, %v20_v11 }
  0x98   :  { %v81_v14 = vld [vmem:[#allocation2] sm:$0xff] }
  0x99   :  { %83 = vst.msk [vmem:[%s160_s2] sm:$0xff] %vm16_vm0, %v81_v14 }
  0x9a   :  { %77 = vst.msk [vmem:[#allocation2 + $0x8] sm:$0xff] %vm16_vm0, %v75_v13 }
  0xa1   :  { %v82_v15 = vld [vmem:[#allocation2 + $0x8] sm:$0xff] }
  0xa2   :  { %84 = vst.msk [vmem:[%s160_s2 + $0x8] sm:$0xff] %vm16_vm0, %v82_v15 }

// kernel: gpt_forward.12
= control target key start
LH: loop header
LB: loop body
LE: loop exit
PB: predicated region body
PF: predicated region fallthrough
CT: control target
= control target key end

     0   :  { %vm29_vm0 = vcmask 523264   ;;  %v429_v6 = vmov 64.0   ;;  %vm77_vm5 = vcmask 519168   ;;  %v430_v63 = vmov 0.0   ;;  %s539_s0 = inlined_call_operand.vmem [shape: f32[16,64], index: 0, kind: input, shape index: {}]   ;;  %s540_s1 = inlined_call_operand.vmem [shape: f32[1,64], index: 1, kind: input, shape index: {}]   ;;  %s541_s2 = inlined_call_operand.vmem [shape: bf16[64,128], index: 2, kind: input, shape index: {}]   ;;  %s542_s3 = inlined_call_operand.vmem [shape: bf16[64,128], index: 3, kind: input, shape index: {}]   ;;  %s543_s4 = inlined_call_operand.vmem [shape: bf16[128,64], index: 4, kind: input, shape index: {}]   ;;  %s544_s5 = inlined_call_operand.vmem [shape: f32[16,64], index: 5, kind: output, shape index: {}]  }
   0x1   :  { %v25_v0 = vld [vmem:[%s539_s0] sm:$0xff]  ;;  %v467_v2 = vld [vmem:[%s539_s0 + $0x8] sm:$0xff]  ;;  %415 = vrcp.f32 %v429_v6  ;;  %v399_v12 = vld [vmem:[%s541_s2 + $0x18] sm:$0xff]  ;;  %80 = vst.msk [vmem:[#allocation3] sm:$0xff] %vm29_vm0, %v430_v63 }
   0x2   :  { %v27_v1 = vmul.f32 %v25_v0, %v25_v0  ;;  %v28_v4 = vmul.f32 %v467_v2, %v467_v2  ;;  %v403_v13 = vld [vmem:[%s542_s3 + $0x18] sm:$0xff]  ;;  %129 = vmatpush.bf16.msra.mxu0 %v399_v12  ;;  %v398_v17 = vld [vmem:[%s541_s2 + $0x10] sm:$0xff]  ;;  %v397_v20 = vld [vmem:[%s541_s2 + $0x8] sm:$0xff]  ;;  %81 = vst.msk [vmem:[#allocation3 + $0x8] sm:$0xff] %vm29_vm0, %v430_v63 }
   0x3   :  { %175 = vmatpush.bf16.msra.mxu1 %v403_v13  ;;  %v402_v18 = vld [vmem:[%s542_s3 + $0x10] sm:$0xff]  ;;  %v401_v21 = vld [vmem:[%s542_s3 + $0x8] sm:$0xff]  ;;  %v396_v22 = vld [vmem:[%s541_s2] sm:$0xff] }
   0x4   :  { %v30_v3 = vsel %vm29_vm0, %v27_v1, 0.0  ;;  %v33_v5 = vsel %vm29_vm0, %v28_v4, 0.0  ;;  %v400_v23 = vld [vmem:[%s542_s3] sm:$0xff]  ;;  %v411_v49 = vld [vmem:[%s543_s4 + $0x38] sm:$0xff]  ;;  %v410_v50 = vld [vmem:[%s543_s4 + $0x30] sm:$0xff] }
   0x5   :  { %31 = vadd.xlane.f32.xlu0 %v30_v3  ;;  %v414_v35 = vld [vmem:[%s540_s1] ss:$0 sm:$0xff]  ;;  %294 = vmatpush.bf16.msra.mxu2 %v411_v49  ;;  %v409_v51 = vld [vmem:[%s543_s4 + $0x28] sm:$0xff]  ;;  %v407_v53 = vld [vmem:[%s543_s4 + $0x18] sm:$0xff] }
   0x6   :  { %130 = vmatpush.bf16.msra.mxu0 %v398_v17  ;;  %v408_v52 = vld [vmem:[%s543_s4 + $0x20] sm:$0xff]  ;;  %v406_v54 = vld [vmem:[%s543_s4 + $0x10] sm:$0xff]  ;;  %v405_v57 = vld [vmem:[%s543_s4 + $0x8] sm:$0xff] }
   0x7   :  { %v416_v7 = vpop.eup %415  ;;  %176 = vmatpush.bf16.msra.mxu1 %v402_v18  ;;  %v404_v58 = vld [vmem:[%s543_s4] sm:$0xff] }
   0x8   :  { %v37_v8 = vmul.f32 64.0, %v416_v7  ;;  %vm41_vm1 = vweird.f32 %v416_v7 }
   0x9   :  { %295 = vmatpush.bf16.msra.mxu2 %v410_v50 }
   0xa   :  { %v38_v9 = vsub.f32 1.0, %v37_v8  ;;  %131 = vmatpush.bf16.msra.mxu0 %v397_v20 }
   0xb   :  { %177 = vmatpush.bf16.msra.mxu1 %v401_v21 }
   0xc   :  { %v39_v10 = vmul.f32 %v416_v7, %v38_v9 }
   0xd   :  { %34 = vadd.xlane.f32.xlu0 %v33_v5  ;;  %296 = vmatpush.bf16.msra.mxu2 %v409_v51 }
   0xe   :  { %v40_v11 = vadd.f32 %v416_v7, %v39_v10  ;;  %132 = vmatpush.bf16.msra.mxu0 %v396_v22 }
   0xf   :  { %178 = vmatpush.bf16.msra.mxu1 %v400_v23 }
  0x10   :  { %v42_v14 = vsel %vm41_vm1, %v416_v7, %v40_v11 }
  0x11   :  { %297 = vmatpush.bf16.msra.mxu2 %v408_v52 }
  0x15   :  { %298 = vmatpush.bf16.msra.mxu2 %v407_v53 }
  0x19   :  { %299 = vmatpush.bf16.msra.mxu2 %v406_v54 }
  0x1d   :  { %300 = vmatpush.bf16.msra.mxu2 %v405_v57 }
  0x21   :  { %301 = vmatpush.bf16.msra.mxu2 %v404_v58 }
  0x78   :  { %v32_v15 = vpop.xlane.xlu0 %31 }
  0x79   :  { %v43_v16 = vmul.f32 %v42_v14, %v32_v15 }
  0x7b   :  { %v45_v19 = vadd.f32 1e-05, %v43_v16 }
  0x7d   :  { %417 = vrsqrt.f32 %v45_v19  ;;  %vm53_vm3 = vweird.f32 %v45_v19 }
  0x80   :  { %v35_v24 = vpop.xlane.xlu0 %34 }
  0x81   :  { %v44_v25 = vmul.f32 %v42_v14, %v35_v24 }
  0x83   :  { %v418_v26 = vpop.eup %417  ;;  %v46_v27 = vadd.f32 1e-05, %v44_v25 }
  0x84   :  { %v48_v28 = vmul.f32 %v418_v26, %v45_v19  ;;  %vm54_vm2 = vweird.f32 %v418_v26 }
  0x85   :  { %419 = vrsqrt.f32 %v46_v27  ;;  %vm55_vm4 = vmor %vm53_vm3, %vm54_vm2  ;;  %vm63_vm7 = vweird.f32 %v46_v27 }
  0x86   :  { %v49_v29 = vmul.f32 %v418_v26, %v48_v28 }
  0x88   :  { %v50_v30 = vmul.f32 0.5, %v49_v29  ;;  %v227_v29 = vld [vmem:[#allocation3] sm:$0xff] }
  0x8a   :  { %v51_v31 = vsub.f32 1.5, %v50_v30 }
  0x8b   :  { %v420_v32 = vpop.eup %419 }
  0x8c   :  { %v52_v33 = vmul.f32 %v418_v26, %v51_v31  ;;  %v58_v34 = vmul.f32 %v420_v32, %v46_v27  ;;  %vm64_vm6 = vweird.f32 %v420_v32 }
  0x8d   :  { %vm65_vm8 = vmor %vm63_vm7, %vm64_vm6 }
  0x8e   :  { %v56_v36 = vsel %vm55_vm4, %v418_v26, %v52_v33  ;;  %v59_v37 = vmul.f32 %v420_v32, %v58_v34 }
  0x8f   :  { %v67_v38 = vmul.f32 %v56_v36, %v25_v0 }
  0x90   :  { %v60_v39 = vmul.f32 0.5, %v59_v37 }
  0x91   :  { %v73_v40 = vmul.f32 %v414_v35, %v67_v38 }
  0x92   :  { %v61_v41 = vsub.f32 1.5, %v60_v39 }
  0x93   :  { %v75_v42 = vpack.c.bf16 %v73_v40, %v73_v40 }
  0x94   :  { %v62_v43 = vmul.f32 %v420_v32, %v61_v41 }
  0x95   :  { %78 = vst.msk [vmem:[#allocation2] sm:$0xf] %vm77_vm5, %v75_v42 }
  0x96   :  { %v66_v44 = vsel %vm65_vm8, %v420_v32, %v62_v43  ;;  %v228_v32 = vld [vmem:[#allocation3 + $0x8] sm:$0xff] }
  0x97   :  { %v68_v45 = vmul.f32 %v66_v44, %v467_v2 }
  0x99   :  { %v74_v46 = vmul.f32 %v414_v35, %v68_v45 }
  0x9b   :  { %v76_v47 = vpack.c.bf16 %v74_v46, %v74_v46 }
  0x9d   :  { %79 = vst.msk [vmem:[#allocation2 + $0x4] sm:$0xf] %vm77_vm5, %v76_v47 }
  0xa4   :  { %v395_v48 = vld [vmem:[#allocation2] sm:$0xff] }
  0xa5   :  { %343 = vmatmul.msk.bf16.vlgmr.msra.gmra.mxu0 %vm29_vm0, %v395_v48  ;;  %360 = vmatmul.msk.bf16.vlgmr.msra.gmra.mxu1 %vm29_vm0, %v395_v48 }
 0x122   :  { %v134_v55 = vpop.f32.mrf.mxu0  ;;  %v180_v11 = vpop.f32.mrf.mxu1 }
 0x123   :  { %v361_v56 = vmul.f32 -1.442695, %v134_v55 }
 0x125   :  { %421 = vpow2.f32 %v361_v56 }
 0x12a   :  { %v136_v59 = vpop.f32.mrf.mxu0  ;;  %v182_v25 = vpop.f32.mrf.mxu1 }
 0x12b   :  { %v422_v60 = vpop.eup %421  ;;  %v362_v61 = vmul.f32 -1.442695, %v136_v59 }
 0x12c   :  { %v191_v62 = vadd.f32 1.0, %v422_v60 }
 0x12d   :  { %423 = vpow2.f32 %v362_v61 }
 0x12e   :  { %425 = vrcp.f32 %v191_v62  ;;  %v204_v8 = vand.u32 2147483648, %v191_v62  ;;  %vm198_vm10 = vweird.f32 %v191_v62  ;;  %v202_v9 = vand.u32 2147483647, %v191_v62 }
 0x130   :  { %v205_v14 = vor.u32 1.1754944e-38, %v204_v8  ;;  %vm203_vm12 = vcmp.eq.f32.partialorder %v202_v9, 8.507059e+37 }
 0x133   :  { %v424_v0 = vpop.eup %423 }
 0x134   :  { %v426_v1 = vpop.eup %425  ;;  %v192_v2 = vadd.f32 1.0, %v424_v0 }
 0x135   :  { %v194_v3 = vmul.f32 %v426_v1, %v191_v62  ;;  %vm199_vm9 = vweird.f32 %v426_v1 }
 0x136   :  { %427 = vrcp.f32 %v192_v2  ;;  %vm200_vm11 = vmor %vm198_vm10, %vm199_vm9  ;;  %v219_v15 = vand.u32 2147483648, %v192_v2  ;;  %v217_v17 = vand.u32 2147483647, %v192_v2  ;;  %vm213_vm14 = vweird.f32 %v192_v2 }
 0x137   :  { %v195_v4 = vsub.f32 1.0, %v194_v3 }
 0x138   :  { %v220_v20 = vor.u32 1.1754944e-38, %v219_v15  ;;  %vm218_vm1 = vcmp.eq.f32.partialorder %v217_v17, 8.507059e+37 }
 0x139   :  { %v196_v5 = vmul.f32 %v426_v1, %v195_v4 }
 0x13b   :  { %v197_v6 = vadd.f32 %v426_v1, %v196_v5 }
 0x13c   :  { %v428_v7 = vpop.eup %427 }
 0x13d   :  { %v209_v10 = vmul.f32 %v428_v7, %v192_v2  ;;  %v201_v12 = vsel %vm200_vm11, %v426_v1, %v197_v6  ;;  %vm214_vm13 = vweird.f32 %v428_v7 }
 0x13e   :  { %v206_v18 = vsel %vm203_vm12, %v205_v14, %v201_v12  ;;  %vm215_vm15 = vmor %vm213_vm14, %vm214_vm13 }
 0x13f   :  { %v210_v13 = vsub.f32 1.0, %v209_v10  ;;  %v223_v21 = vmul.f32 %v206_v18, %v134_v55 }
 0x141   :  { %v211_v16 = vmul.f32 %v428_v7, %v210_v13  ;;  %v225_v26 = vmul.f32 %v223_v21, %v180_v11 }
 0x143   :  { %v212_v19 = vadd.f32 %v428_v7, %v211_v16 }
 0x145   :  { %v216_v22 = vsel %vm215_vm15, %v428_v7, %v212_v19 }
 0x146   :  { %v221_v23 = vsel %vm218_vm1, %v220_v20, %v216_v22 }
 0x147   :  { %v224_v24 = vmul.f32 %v221_v23, %v136_v59 }
 0x149   :  { %v226_v27 = vmul.f32 %v224_v24, %v182_v25 }
 0x14b   :  { %v229_v28 = vpack.c.bf16 %v226_v27, %v225_v26 }
 0x14d   :  { %302 = vmatmul.bf16.vlgmr.msra.gmra.mxu2 %v229_v28 }
 0x1d0   :  { %v303_v30 = vpop.f32.mrf.mxu2 }
 0x1d1   :  { %v308_v31 = vadd.f32 %v303_v30, %v227_v29 }
 0x1d3   :  { %310 = vst.msk [vmem:[#allocation3] sm:$0xff] %vm29_vm0, %v308_v31 }
 0x1d8   :  { %v305_v33 = vpop.f32.mrf.mxu2 }
 0x1d9   :  { %v309_v34 = vadd.f32 %v305_v33, %v228_v32 }
 0x1da   :  { %v315_v35 = vld [vmem:[#allocation3] sm:$0xff] }
 0x1db   :  { %317 = vst.msk [vmem:[%s544_s5] sm:$0xff] %vm29_vm0, %v315_v35 }
 0x1dc   :  { %311 = vst.msk [vmem:[#allocation3 + $0x8] sm:$0xff] %vm29_vm0, %v309_v34 }
 0x1e3   :  { %v316_v36 = vld [vmem:[#allocation3 + $0x8] sm:$0xff] }
 0x1e4   :  { %318 = vst.msk [vmem:[%s544_s5 + $0x8] sm:$0xff] %vm29_vm0, %v316_v36 }

// kernel: gpt_forward.17
= control target key start
LH: loop header
LB: loop body
LE: loop exit
PB: predicated region body
PF: predicated region fallthrough
CT: control target
= control target key end

     0   :  { %vm158_vm0 = vcmask 523264   ;;  %vm16_vm1 = vcmask 517120   ;;  %v335_v25 = vmov 64.0   ;;  %vm239_vm6 = vcmask 1041408   ;;  %s436_s0 = inlined_call_operand.vmem [shape: f32[2,64], index: 0, kind: input, shape index: {}]   ;;  %s437_s2 = inlined_call_operand.vmem [shape: bf16[256,64], index: 2, kind: input, shape index: {}]   ;;  %s438_s1 = inlined_call_operand.vmem [shape: f32[1,64], index: 1, kind: input, shape index: {}]   ;;  %s439_s3 = inlined_call_operand.vmem [shape: f32[2,256], index: 3, kind: output, shape index: {}]  }
   0x1   :  { %v359_v0 = vld [vmem:[%s436_s0] sm:$0x3]  ;;  %v320_v1 = vld [vmem:[%s437_s2 + $0x38] sm:$0xff]  ;;  %v319_v7 = vld [vmem:[%s437_s2 + $0x30] sm:$0xff]  ;;  %331 = vrcp.f32 %v335_v25 }
   0x2   :  { %v328_v2 = vld [vmem:[%s437_s2 + $0x78] sm:$0xff]  ;;  %v15_v3 = vmul.f32 %v359_v0, %v359_v0  ;;  %v184_v4 = vsel %vm158_vm0, %v320_v1, 0  ;;  %v327_v8 = vld [vmem:[%s437_s2 + $0x70] sm:$0xff]  ;;  %v181_v9 = vsel %vm158_vm0, %v319_v7, 0  ;;  %v318_v11 = vld [vmem:[%s437_s2 + $0x28] sm:$0xff] }
   0x3   :  { %v208_v5 = vsel %vm158_vm0, %v328_v2, 0  ;;  %210 = vmatpush.bf16.xpose.msra.mxu0 %v184_v4  ;;  %v205_v10 = vsel %vm158_vm0, %v327_v8, 0  ;;  %v326_v12 = vld [vmem:[%s437_s2 + $0x68] sm:$0xff]  ;;  %v178_v13 = vsel %vm158_vm0, %v318_v11, 0  ;;  %v317_v15 = vld [vmem:[%s437_s2 + $0x20] sm:$0xff]  ;;  %v316_v19 = vld [vmem:[%s437_s2 + $0x18] sm:$0xff] }
   0x4   :  { %v17_v6 = vsel %vm16_vm1, %v15_v3, 0.0  ;;  %223 = vmatpush.bf16.xpose.msra.mxu1 %v208_v5  ;;  %v202_v14 = vsel %vm158_vm0, %v326_v12, 0  ;;  %v325_v16 = vld [vmem:[%s437_s2 + $0x60] sm:$0xff]  ;;  %v175_v17 = vsel %vm158_vm0, %v317_v15, 0  ;;  %v324_v20 = vld [vmem:[%s437_s2 + $0x58] sm:$0xff]  ;;  %v172_v21 = vsel %vm158_vm0, %v316_v19, 0 }
   0x5   :  { %18 = vadd.xlane.f32.xlu0 %v17_v6  ;;  %v199_v18 = vsel %vm158_vm0, %v325_v16, 0  ;;  %v196_v22 = vsel %vm158_vm0, %v324_v20, 0  ;;  %v315_v23 = vld [vmem:[%s437_s2 + $0x10] sm:$0xff]  ;;  %v314_v29 = vld [vmem:[%s437_s2 + $0x8] sm:$0xff]  ;;  %v313_v35 = vld [vmem:[%s437_s2] sm:$0xff] }
   0x6   :  { %v323_v24 = vld [vmem:[%s437_s2 + $0x50] sm:$0xff]  ;;  %v169_v26 = vsel %vm158_vm0, %v315_v23, 0  ;;  %v322_v30 = vld [vmem:[%s437_s2 + $0x48] sm:$0xff]  ;;  %v166_v31 = vsel %vm158_vm0, %v314_v29, 0  ;;  %v321_v36 = vld [vmem:[%s437_s2 + $0x40] sm:$0xff]  ;;  %v163_v37 = vsel %vm158_vm0, %v313_v35, 0 }
   0x7   :  { %v193_v27 = vsel %vm158_vm0, %v323_v24, 0  ;;  %v332_v28 = vpop.eup %331  ;;  %v190_v32 = vsel %vm158_vm0, %v322_v30, 0  ;;  %v187_v38 = vsel %vm158_vm0, %v321_v36, 0  ;;  %v330_v51 = vld [vmem:[%s438_s1] ss:$0 sm:$0xff] }
   0x8   :  { %v21_v33 = vmul.f32 64.0, %v332_v28  ;;  %vm25_vm2 = vweird.f32 %v332_v28 }
   0xa   :  { %v22_v34 = vsub.f32 1.0, %v21_v33 }
   0xb   :  { %211 = vmatpush.bf16.xpose.msra.mxu0 %v181_v9 }
   0xc   :  { %224 = vmatpush.bf16.xpose.msra.mxu1 %v205_v10  ;;  %v23_v39 = vmul.f32 %v332_v28, %v22_v34 }
   0xe   :  { %v24_v40 = vadd.f32 %v332_v28, %v23_v39 }
  0x10   :  { %v26_v41 = vsel %vm25_vm2, %v332_v28, %v24_v40 }
  0x13   :  { %212 = vmatpush.bf16.xpose.msra.mxu0 %v178_v13 }
  0x14   :  { %225 = vmatpush.bf16.xpose.msra.mxu1 %v202_v14 }
  0x1b   :  { %213 = vmatpush.bf16.xpose.msra.mxu0 %v175_v17 }
  0x1c   :  { %226 = vmatpush.bf16.xpose.msra.mxu1 %v199_v18 }
  0x23   :  { %214 = vmatpush.bf16.xpose.msra.mxu0 %v172_v21 }
  0x24   :  { %227 = vmatpush.bf16.xpose.msra.mxu1 %v196_v22 }
  0x2b   :  { %215 = vmatpush.bf16.xpose.msra.mxu0 %v169_v26 }
  0x2c   :  { %228 = vmatpush.bf16.xpose.msra.mxu1 %v193_v27 }
  0x33   :  { %216 = vmatpush.bf16.xpose.msra.mxu0 %v166_v31 }
  0x34   :  { %229 = vmatpush.bf16.xpose.msra.mxu1 %v190_v32 }
  0x3b   :  { %217 = vmatpush.bf16.xpose.msra.mxu0 %v163_v37 }
  0x3c   :  { %230 = vmatpush.bf16.xpose.msra.mxu1 %v187_v38 }
  0x78   :  { %v19_v42 = vpop.xlane.xlu0 %18 }
  0x79   :  { %v27_v43 = vmul.f32 %v26_v41, %v19_v42 }
  0x7b   :  { %v28_v44 = vadd.f32 1e-05, %v27_v43 }
  0x7d   :  { %333 = vrsqrt.f32 %v28_v44  ;;  %vm35_vm4 = vweird.f32 %v28_v44 }
  0x83   :  { %v334_v45 = vpop.eup %333 }
  0x84   :  { %v30_v46 = vmul.f32 %v334_v45, %v28_v44  ;;  %vm36_vm3 = vweird.f32 %v334_v45 }
  0x85   :  { %vm37_vm5 = vmor %vm35_vm4, %vm36_vm3 }
  0x86   :  { %v31_v47 = vmul.f32 %v334_v45, %v30_v46 }
  0x88   :  { %v32_v48 = vmul.f32 0.5, %v31_v47 }
  0x8a   :  { %v33_v49 = vsub.f32 1.5, %v32_v48 }
  0x8c   :  { %v34_v50 = vmul.f32 %v334_v45, %v33_v49 }
  0x8e   :  { %v38_v52 = vsel %vm37_vm5, %v334_v45, %v34_v50 }
  0x8f   :  { %v39_v53 = vmul.f32 %v38_v52, %v359_v0 }
  0x91   :  { %v44_v54 = vmul.f32 %v330_v51, %v39_v53 }
  0x93   :  { %v45_v55 = vpack.c.bf16 %v44_v54, %v44_v54 }
  0x95   :  { %311 = vmatmul.msk.bf16.vlgmr.msra.gmra.mxu0 %vm158_vm0, %v45_v55  ;;  %312 = vmatmul.msk.bf16.vlgmr.msra.gmra.mxu1 %vm158_vm0, %v45_v55 }
 0x112   :  { %v219_v56 = vpop.f32.mrf.mxu0  ;;  %v232_v57 = vpop.f32.mrf.mxu1 }
 0x113   :  { %v238_v58 = vrot.slane %v232_v57, 6 }
 0x115   :  { %v240_v59 = vsel %vm239_vm6, %v219_v56, %v238_v58 }
 0x116   :  { %242 = vst [vmem:[%s439_s3] sm:$0xf] %v240_v59 }
 0x11a   :  { %v221_v60 = vpop.f32.mrf.mxu0  ;;  %v234_v61 = vpop.f32.mrf.mxu1 }

</bundles_post_ra>
